<compile_context>
chip_gen: v6e
topology: v6e:2x2x1
jax: 0.10.0
libtpu: 0.0.40
codegen_flags: <defaults>
</compile_context>

<pallas_src>
import jax
import jax.numpy as jnp
from jax.experimental import pallas as pl
from jax.experimental.pallas import tpu as pltpu

EPS = 1e-5
NEG_SLOPE = 0.2


# =============================================================================
# Single-buffering support probe (pipeline_mode=pl.Buffered(1) for grid-invariant
# operands).  Falls back to default double-buffering if unsupported.
# =============================================================================
_SINGLE_BUF_OK = None


def _probe_kernel(x_ref, o_ref):
    o_ref[...] = x_ref[...] + 1.0


def _single_buffer_supported():
    global _SINGLE_BUF_OK
    if _SINGLE_BUF_OK is not None:
        return _SINGLE_BUF_OK
    ok = False
    if hasattr(pl, "Buffered"):
        try:
            spec = pl.BlockSpec((8, 128), lambda i: (0, 0),
                                pipeline_mode=pl.Buffered(1))
            out = pl.pallas_call(
                _probe_kernel,
                out_shape=jax.ShapeDtypeStruct((16, 128), jnp.float32),
                grid_spec=pltpu.PrefetchScalarGridSpec(
                    num_scalar_prefetch=0, grid=(2,),
                    in_specs=[spec],
                    out_specs=pl.BlockSpec((8, 128), lambda i: (i, 0))),
            )(jnp.zeros((8, 128), jnp.float32))
            jax.block_until_ready(out)
            ok = True
        except Exception:
            ok = False
    _SINGLE_BUF_OK = ok
    return ok


def _const_spec(block_shape, index_map):
    """BlockSpec for a grid-invariant operand; single-buffered when supported."""
    if _single_buffer_supported():
        return pl.BlockSpec(block_shape, index_map, pipeline_mode=pl.Buffered(1))
    return pl.BlockSpec(block_shape, index_map)


# =============================================================================
# Constant operator construction (wrapper-side weight preprocessing, pure JAX).
# =============================================================================
def _conv3_lane_ops(w_oihw, win, up):
    """M (3, Win*Cin, Wout*Cout): kx taps + optional W-upsample + channel mix."""
    cout, cin = w_oihw.shape[0], w_oihw.shape[1]
    wout = 2 * win if up else win
    xu = jnp.arange(wout)
    mats = []
    for ky in range(3):
        m = jnp.zeros((win * cin, wout * cout), jnp.float32)
        for kx in range(3):
            src = xu + kx - 1                                   # col in conv-input domain
            valid = ((src >= 0) & (src < wout)).astype(jnp.float32)
            xi = src // 2 if up else src                        # source col in stored image
            sel = jax.nn.one_hot(xi, win, dtype=jnp.float32) * valid[:, None]  # (wout, win)
            wk = w_oihw[:, :, ky, kx].T.astype(jnp.float32)                     # (cin, cout)
            m = m + (sel.T[:, None, :, None] * wk[None, :, None, :]).reshape(
                win * cin, wout * cout)
        mats.append(m)
    return jnp.stack(mats)


def _conv1_lane_op(wsc_oi, win, up):
    """S (Win*Cin, Wout*Cout): 1x1 shortcut conv (+ optional W-upsample)."""
    cout, cin = wsc_oi.shape
    wout = 2 * win if up else win
    xi = jnp.arange(wout) // 2 if up else jnp.arange(wout)
    sel = jax.nn.one_hot(xi, win, dtype=jnp.float32)            # (wout, win)
    wk = wsc_oi.T.astype(jnp.float32)                           # (cin, cout)
    return (sel.T[:, None, :, None] * wk[None, :, None, :]).reshape(win * cin, wout * cout)


def _row_shift_ops(hin, up):
    """R (3, Hout, Hin): (R[ky] @ img)[y] = source row of tap ky (0 rows at pad)."""
    hout = 2 * hin if up else hin
    yu = jnp.arange(hout)
    ops = []
    for ky in range(3):
        src = yu + ky - 1
        valid = ((src >= 0) & (src < hout)).astype(jnp.float32)
        yi = src // 2 if up else src
        ops.append(jax.nn.one_hot(yi, hin, dtype=jnp.float32) * valid[:, None])
    return jnp.stack(ops)


def _row_repeat_op(hin, up):
    """(Hout, Hin) row-repeat operator for the shortcut path (identity if not up)."""
    yi = jnp.arange(2 * hin) // 2 if up else jnp.arange(hin)
    return jax.nn.one_hot(yi, hin, dtype=jnp.float32)


def _lane_tile(v, reps):
    """Per-channel vector -> per-lane (1, reps*C) row (channels fastest)."""
    return jnp.tile(v.astype(jnp.float32), reps).reshape(1, reps * v.shape[0])


def _pick_batch(n, rows_per_image, target_rows=256):
    """Images per grid step: aim for >= target_rows MXU rows per dominant dot
    (256 rows on v6e/v7x, 128 suffices on v5e), keep >= 2 grid steps when possible
    (v7x has 2 TensorCores), and require even division of N."""
    b = min(n, max(1, -(-target_rows // rows_per_image)))
    while b > 1 and -(-n // b) < 2:
        b -= 1
    while n % b != 0:
        b -= 1
    return b


# =============================================================================
# Kernel 1: fused BN1 affine + LeakyReLU + (nearest x2 upsample) + conv1 3x3 + bias,
#           plus bn2 partial statistics of the conv output (B images per grid step).
# =============================================================================
def _bn_act_conv_kernel(x_ref, scale_ref, shift_ref, r_ref, m_ref, b_ref,
                        o_ref, s_ref, ss_ref):
    nb = x_ref.shape[0]
    hout, woc = o_ref.shape[1], o_ref.shape[2]
    # BN1 affine + LeakyReLU in f32 (v5e has no bf16 VPU); cast only at the dots.
    h = x_ref[...] * scale_ref[...] + shift_ref[...]          # (B, Hin, Win*Cin)
    h = jnp.where(h >= 0.0, h, NEG_SLOPE * h)
    hb = h.astype(jnp.bfloat16)
    acc = jnp.zeros((nb * hout, woc), jnp.float32)
    for ky in range(3):
        # Per-image row-select / H-upsample: B small dots, stacked to (B*Hout, Win*Cin).
        rows = jnp.concatenate(
            [jnp.dot(r_ref[ky], hb[ib], preferred_element_type=jnp.float32)
             for ib in range(nb)], axis=0).astype(jnp.bfloat16)
        # ONE big MXU dot with M = B*Hout rows against the bf16 Toeplitz operator.
        acc = acc + jnp.dot(rows, m_ref[ky], preferred_element_type=jnp.float32)
    out = acc + b_ref[...]                                    # f32, lane-dense woc=mult of 128
    o_ref[...] = out.reshape(nb, hout, woc)
    # bn2 partial statistics (free filler; avoids a second HBM pass over h1).
    s_ref[0] = jnp.sum(out, axis=0, keepdims=True)
    ss_ref[0] = jnp.sum(out * out, axis=0, keepdims=True)


def bn_act_up_conv3x3(xf, scale_t, shift_t, rops, mops, b_t, batch):
    n, hin, wc = xf.shape
    hout, woc = rops.shape[1], mops.shape[2]
    steps = n // batch
    return pl.pallas_call(
        _bn_act_conv_kernel,
        out_shape=(jax.ShapeDtypeStruct((n, hout, woc), jnp.float32),
                   jax.ShapeDtypeStruct((steps, 1, woc), jnp.float32),
                   jax.ShapeDtypeStruct((steps, 1, woc), jnp.float32)),
        grid_spec=pltpu.PrefetchScalarGridSpec(
            num_scalar_prefetch=0, grid=(steps,),
            in_specs=[pl.BlockSpec((batch, hin, wc), lambda i: (i, 0, 0)),
                      _const_spec((1, wc), lambda i: (0, 0)),
                      _const_spec((1, wc), lambda i: (0, 0)),
                      _const_spec(rops.shape, lambda i: (0, 0, 0)),
                      _const_spec(mops.shape, lambda i: (0, 0, 0)),
                      _const_spec((1, woc), lambda i: (0, 0))],
            out_specs=[pl.BlockSpec((batch, hout, woc), lambda i: (i, 0, 0)),
                       pl.BlockSpec((1, 1, woc), lambda i: (i, 0, 0)),
                       pl.BlockSpec((1, 1, woc), lambda i: (i, 0, 0))]),
        compiler_params=pltpu.CompilerParams(dimension_semantics=("parallel",)),
    )(xf, scale_t, shift_t, rops, mops, b_t)


# =============================================================================
# Kernel 2: fused BN2 affine + LeakyReLU + conv2 3x3 + bias
#           + shortcut (1x1 conv / fused upsample of x) + residual add.
# =============================================================================
def _conv2_rows(h_ref, scale_ref, shift_ref, m_ref):
    """BN2 affine + LeakyReLU + 3x3 conv (no upsample): t_ky = h @ M[ky] and +/-1 row
    shifts with zero padding instead of R matmuls (saves the MXU K=Hout contraction)."""
    nb, hout, woc = h_ref.shape
    h = h_ref[...] * scale_ref[...] + shift_ref[...]
    h = jnp.where(h >= 0.0, h, NEG_SLOPE * h)
    hb = h.reshape(nb * hout, woc).astype(jnp.bfloat16)
    zrow = jnp.zeros((nb, 1, woc), jnp.float32)
    acc = jnp.zeros((nb, hout, woc), jnp.float32)
    for ky in range(3):
        t = jnp.dot(hb, m_ref[ky],
                    preferred_element_type=jnp.float32).reshape(nb, hout, woc)
        if ky == 0:        # out[y] += t[y-1]  (zero row at the top)
            acc = acc + jnp.concatenate([zrow, t[:, :hout - 1, :]], axis=1)
        elif ky == 1:      # out[y] += t[y]
            acc = acc + t
        else:              # out[y] += t[y+1]  (zero row at the bottom)
            acc = acc + jnp.concatenate([t[:, 1:, :], zrow], axis=1)
    return acc


def _bn_act_conv_res_id_kernel(h_ref, x_ref, scale_ref, shift_ref, m_ref, b_ref, o_ref):
    # inc == outc and no upsample: shortcut is x itself (same layout) -- no
    # shortcut-operator DMA, no shortcut matmul.
    acc = _conv2_rows(h_ref, scale_ref, shift_ref, m_ref)
    o_ref[...] = acc + b_ref[...] + x_ref[...]


def _bn_act_conv_res_sc_kernel(h_ref, x_ref, scale_ref, shift_ref, m_ref, b_ref,
                               rsc_ref, ssc_ref, bsc_ref, o_ref):
    acc = _conv2_rows(h_ref, scale_ref, shift_ref, m_ref)
    nb, hout, woc = o_ref.shape
    xb = x_ref[...].astype(jnp.bfloat16)                       # (B, Hin, Win*Cin)
    xr = jnp.concatenate(
        [jnp.dot(rsc_ref[...], xb[ib], preferred_element_type=jnp.float32)
         for ib in range(nb)], axis=0).astype(jnp.bfloat16)    # (B*Hout, Win*Cin)
    sc = jnp.dot(xr, ssc_ref[...],
                 preferred_element_type=jnp.float32).reshape(nb, hout, woc)
    o_ref[...] = acc + b_ref[...] + sc + bsc_ref[...]


def bn_act_conv3x3_residual(h1, xf, scale_t, shift_t, mops, b_t, batch,
                            rsc=None, ssc=None, bsc_t=None):
    n, hout, hc = h1.shape
    hin, wc = xf.shape[1], xf.shape[2]
    woc = mops.shape[2]
    steps = n // batch

    in_specs = [pl.BlockSpec((batch, hout, hc), lambda i: (i, 0, 0)),
                pl.BlockSpec((batch, hin, wc), lambda i: (i, 0, 0)),
                _const_spec((1, hc), lambda i: (0, 0)),
                _const_spec((1, hc), lambda i: (0, 0)),
                _const_spec(mops.shape, lambda i: (0, 0, 0)),
                _const_spec((1, woc), lambda i: (0, 0))]
    args = [h1, xf, scale_t, shift_t, mops, b_t]
    if rsc is not None:
        in_specs += [_const_spec(rsc.shape, lambda i: (0, 0)),
                     _const_spec(ssc.shape, lambda i: (0, 0)),
                     _const_spec((1, woc), lambda i: (0, 0))]
        args += [rsc, ssc, bsc_t]
        kern = _bn_act_conv_res_sc_kernel
    else:
        kern = _bn_act_conv_res_id_kernel

    return pl.pallas_call(
        kern,
        out_shape=jax.ShapeDtypeStruct((n, hout, woc), jnp.float32),
        grid_spec=pltpu.PrefetchScalarGridSpec(
            num_scalar_prefetch=0, grid=(steps,),
            in_specs=in_specs,
            out_specs=pl.BlockSpec((batch, hout, woc), lambda i: (i, 0, 0))),
        compiler_params=pltpu.CompilerParams(dimension_semantics=("parallel",)),
    )(*args)


# =============================================================================
# Full ResidulBlock forward (wrapper = layout glue + tiny BN finalization math).
# =============================================================================
def residual_block_forward(x_nchw, p, sample='none'):
    x = jnp.transpose(x_nchw, (0, 2, 3, 1)).astype(jnp.float32)    # NCHW -> NHWC
    n, hin, win, cin = x.shape
    cout = p['w1'].shape[0]
    up = (sample == 'up')
    hout = 2 * hin if up else hin
    wout = 2 * win if up else win

    xf = x.reshape(n, hin, win * cin)               # lane-flattened (row, W*C) layout

    # --- bn1 batch statistics (training mode, biased var): plain XLA reduction
    #     (memory-bound; the old tiny-tile Pallas stats pass was far below roofline).
    mean1 = jnp.mean(x, axis=(0, 1, 2))
    var1 = jnp.var(x, axis=(0, 1, 2))
    scale1 = p['gamma1'] / jnp.sqrt(var1 + EPS)
    shift1 = p['beta1'] - mean1 * scale1

    batch = _pick_batch(n, hout)

    # --- conv1 stage: nearest-x2 upsample fused into the R/M operators (the 4x
    #     upsampled intermediate never touches HBM); operators in bf16 for the MXU.
    r1 = _row_shift_ops(hin, up).astype(jnp.bfloat16)              # (3, Hout, Hin)
    m1 = _conv3_lane_ops(p['w1'], win, up).astype(jnp.bfloat16)    # (3, Win*Cin, Wout*Cout)
    h1, s2, ss2 = bn_act_up_conv3x3(
        xf, _lane_tile(scale1, win), _lane_tile(shift1, win),
        r1, m1, _lane_tile(p['b1'], wout), batch)

    # --- bn2 statistics from kernel 1's partial sums (no second HBM pass over h1).
    cnt2 = float(n * hout * wout)
    mean2 = jnp.sum(s2, axis=(0, 1)).reshape(wout, cout).sum(axis=0) / cnt2
    # TODO(synk): single-pass E[x^2]-mean^2 (clamped); switch to shifted moments /
    #             Welford if activations develop large means.
    e2 = jnp.sum(ss2, axis=(0, 1)).reshape(wout, cout).sum(axis=0) / cnt2
    var2 = jnp.maximum(e2 - mean2 * mean2, 0.0)
    scale2 = p['gamma2'] / jnp.sqrt(var2 + EPS)
    shift2 = p['beta2'] - mean2 * scale2

    # --- conv2 + shortcut + residual.
    m2 = _conv3_lane_ops(p['w2'], wout, False).astype(jnp.bfloat16)  # (3, Wout*Cout, Wout*Cout)
    scale2_t = _lane_tile(scale2, wout)
    shift2_t = _lane_tile(shift2, wout)
    b2_t = _lane_tile(p['b2'], wout)

    has_sc = p.get('wsc') is not None
    if has_sc or up:
        wsc = p['wsc'][:, :, 0, 0] if has_sc else jnp.eye(cout, dtype=jnp.float32)
        bsc = p['bsc'] if has_sc else jnp.zeros((cout,), jnp.float32)
        rsc = _row_repeat_op(hin, up).astype(jnp.bfloat16)           # (Hout, Hin)
        ssc = _conv1_lane_op(wsc, win, up).astype(jnp.bfloat16)      # (Win*Cin, Wout*Cout)
        out = bn_act_conv3x3_residual(h1, xf, scale2_t, shift2_t, m2, b2_t, batch,
                                      rsc, ssc, _lane_tile(bsc, wout))
    else:
        out = bn_act_conv3x3_residual(h1, xf, scale2_t, shift2_t, m2, b2_t, batch)

    out = out.reshape(n, hout, wout, cout)
    return jnp.transpose(out, (0, 3, 1, 2))         # NHWC -> NCHW


# =============================================================================
# Parameter setup (deterministic) + pure-JAX reference for verification.
# =============================================================================
def spectral_normalize(w):
    # TODO(synk): torch's spectral_norm uses a single power-iteration step with a
    # random persistent u vector; here we apply the converged spectral norm.
    m = w.reshape(w.shape[0], -1).astype(jnp.float32)
    v = jnp.ones((m.shape[1],), jnp.float32) / jnp.sqrt(m.shape[1])
    for _ in range(50):
        u = m @ v
        u = u / (jnp.linalg.norm(u) + 1e-12)
        v = m.T @ u
        v = v / (jnp.linalg.norm(v) + 1e-12)
    sigma = u @ (m @ v)
    return w / sigma


def make_params(key, inc, outc):
    ks = jax.random.split(key, 6)
    p = {
        'w1': spectral_normalize(0.3 * jax.random.normal(ks[0], (outc, inc, 3, 3), jnp.float32)),
        'b1': 0.1 * jax.random.normal(ks[1], (outc,), jnp.float32),
        'w2': spectral_normalize(0.3 * jax.random.normal(ks[2], (outc, outc, 3, 3), jnp.float32)),
        'b2': 0.1 * jax.random.normal(ks[3], (outc,), jnp.float32),
        'gamma1': jnp.ones((inc,), jnp.float32),
        'beta1': jnp.zeros((inc,), jnp.float32),
        'gamma2': jnp.ones((outc,), jnp.float32),
        'beta2': jnp.zeros((outc,), jnp.float32),
    }
    if inc != outc:
        p['wsc'] = spectral_normalize(0.3 * jax.random.normal(ks[4], (outc, inc, 1, 1), jnp.float32))
        p['bsc'] = 0.1 * jax.random.normal(ks[5], (outc,), jnp.float32)
    else:
        p['wsc'] = None
        p['bsc'] = None
    return p


def reference_forward(x, p, sample='none'):
    def bn(t, gamma, beta):
        mean = jnp.mean(t, axis=(0, 2, 3), keepdims=True)
        var = jnp.var(t, axis=(0, 2, 3), keepdims=True)
        return (t - mean) / jnp.sqrt(var + EPS) * gamma[None, :, None, None] \
            + beta[None, :, None, None]

    def act(t):
        return jnp.where(t >= 0, t, NEG_SLOPE * t)

    def conv(t, w, b, pad):
        y = jax.lax.conv_general_dilated(
            t, w, (1, 1), [(pad, pad), (pad, pad)],
            dimension_numbers=('NCHW', 'OIHW', 'NCHW'))
        return y + b[None, :, None, None]

    h = act(bn(x, p['gamma1'], p['beta1']))
    if sample == 'up':
        h = jnp.repeat(jnp.repeat(h, 2, axis=2), 2, axis=3)
        x = jnp.repeat(jnp.repeat(x, 2, axis=2), 2, axis=3)
    h = conv(h, p['w1'], p['b1'], 1)
    h = act(bn(h, p['gamma2'], p['beta2']))
    h = conv(h, p['w2'], p['b2'], 1)
    if p['wsc'] is not None:
        x = conv(x, p['wsc'], p['bsc'], 0)
    return x + h


if __name__ == "__main__":
    key = jax.random.PRNGKey(0)
    kx, kp = jax.random.split(key)

    # N=4 exercises the image-batched grid (B=2 images per step, 2 grid steps).
    N, inc, outc, H, W = 4, 4, 8, 16, 16
    x = jax.random.normal(kx, (N, inc, H, W), jnp.float32)
    params = make_params(kp, inc, outc)

    out = residual_block_forward(x, params, sample='up')
    out = jax.block_until_ready(out)

    ref = reference_forward(x, params, sample='up')
    assert out.shape == ref.shape == (N, outc, 2 * H, 2 * W)
    # bf16 MXU operands (f32 accumulation) -> tolerance loosened vs a pure-f32 ref.
    assert bool(jnp.allclose(out, ref, atol=5e-2, rtol=5e-2)), \
        float(jnp.max(jnp.abs(out - ref)))

    print("KERNEL_OK")
</pallas_src>

<mosaic_0001>
module attributes {stable_mosaic.version = 11 : i64} {
  func.func @_probe_kernel(%arg0: i32, %arg1: memref<8x128xf32, #tpu.memory_space<vmem>>, %arg2: memref<8x128xf32, #tpu.memory_space<vmem>>) attributes {dimension_semantics = [#tpu.dimension_semantics<arbitrary>], iteration_bounds = array<i64: 2>, scalar_prefetch = 0 : i64, scratch_operands = 0 : i64, tpu.core_type = #tpu.core_type<tc>, window_params = [{pipeline_mode = #tpu.pipeline_mode<synchronous>, transform_indices = @transform_0, window_bounds = array<i64: 8, 128>}, {transform_indices = @transform_1, window_bounds = array<i64: 8, 128>}]} {
    %c0 = arith.constant 0 : index
    %c0_0 = arith.constant 0 : index
    %0 = vector.load %arg1[%c0, %c0_0] : memref<8x128xf32, #tpu.memory_space<vmem>>, vector<8x128xf32>
    %cst = arith.constant 1.000000e+00 : f32
    %1 = vector.broadcast %cst : f32 to vector<8x128xf32>
    %2 = arith.addf %0, %1 : vector<8x128xf32>
    %c0_1 = arith.constant 0 : index
    %c0_2 = arith.constant 0 : index
    %3 = vector.load %arg2[%c0_1, %c0_2] : memref<8x128xf32, #tpu.memory_space<vmem>>, vector<8x128xf32>
    tpu.vector_store %arg2[%c0_1, %c0_2], %2 {strides = array<i32>} : memref<8x128xf32, #tpu.memory_space<vmem>>, vector<8x128xf32>,
    return
  }
  func.func @transform_0(%arg0: i32) -> (i32, i32) {
    %c0_i32 = arith.constant 0 : i32
    %c0_i32_0 = arith.constant 0 : i32
    %c0_i32_1 = arith.constant 0 : i32
    return %c0_i32, %c0_i32_0 : i32, i32
  }
  func.func @transform_1(%arg0: i32) -> (i32, i32) {
    %c0_i32 = arith.constant 0 : i32
    %c0_i32_0 = arith.constant 0 : i32
    return %arg0, %c0_i32 : i32, i32
  }
}

module attributes {stable_mosaic.version = 11 : i64} {
  func.func @_bn_act_conv_kernel(%arg0: i32, %arg1: memref<2x16x64xf32, #tpu.memory_space<vmem>>, %arg2: memref<1x64xf32, #tpu.memory_space<vmem>>, %arg3: memref<1x64xf32, #tpu.memory_space<vmem>>, %arg4: memref<3x32x16xbf16, #tpu.memory_space<vmem>>, %arg5: memref<3x64x256xbf16, #tpu.memory_space<vmem>>, %arg6: memref<1x256xf32, #tpu.memory_space<vmem>>, %arg7: memref<2x32x256xf32, #tpu.memory_space<vmem>>, %arg8: memref<1x1x256xf32, #tpu.memory_space<vmem>>, %arg9: memref<1x1x256xf32, #tpu.memory_space<vmem>>) attributes {dimension_semantics = [#tpu.dimension_semantics<parallel>], iteration_bounds = array<i64: 2>, scalar_prefetch = 0 : i64, scratch_operands = 0 : i64, tpu.core_type = #tpu.core_type<tc>, window_params = [{transform_indices = @transform_0, window_bounds = array<i64: 2, 16, 64>}, {pipeline_mode = #tpu.pipeline_mode<synchronous>, transform_indices = @transform_1, window_bounds = array<i64: 1, 64>}, {pipeline_mode = #tpu.pipeline_mode<synchronous>, transform_indices = @transform_2, window_bounds = array<i64: 1, 64>}, {pipeline_mode = #tpu.pipeline_mode<synchronous>, transform_indices = @transform_3, window_bounds = array<i64: 3, 32, 16>}, {pipeline_mode = #tpu.pipeline_mode<synchronous>, transform_indices = @transform_4, window_bounds = array<i64: 3, 64, 256>}, {pipeline_mode = #tpu.pipeline_mode<synchronous>, transform_indices = @transform_5, window_bounds = array<i64: 1, 256>}, {transform_indices = @transform_6, window_bounds = array<i64: 2, 32, 256>}, {transform_indices = @transform_7, window_bounds = array<i64: 1, 1, 256>}, {transform_indices = @transform_8, window_bounds = array<i64: 1, 1, 256>}]} {
    %c0 = arith.constant 0 : index
    %c0_0 = arith.constant 0 : index
    %c0_1 = arith.constant 0 : index
    %0 = vector.load %arg1[%c0, %c0_0, %c0_1] : memref<2x16x64xf32, #tpu.memory_space<vmem>>, vector<2x16x64xf32>
    %c0_2 = arith.constant 0 : index
    %c0_3 = arith.constant 0 : index
    %1 = vector.load %arg2[%c0_2, %c0_3] : memref<1x64xf32, #tpu.memory_space<vmem>>, vector<1x64xf32>
    %2 = vector.shape_cast %1 : vector<1x64xf32> to vector<1x1x64xf32>
    %3 = vector.broadcast %2 : vector<1x1x64xf32> to vector<2x16x64xf32>
    %4 = arith.mulf %0, %3 : vector<2x16x64xf32>
    %c0_4 = arith.constant 0 : index
    %c0_5 = arith.constant 0 : index
    %5 = vector.load %arg3[%c0_4, %c0_5] : memref<1x64xf32, #tpu.memory_space<vmem>>, vector<1x64xf32>
    %6 = vector.shape_cast %5 : vector<1x64xf32> to vector<1x1x64xf32>
    %7 = vector.broadcast %6 : vector<1x1x64xf32> to vector<2x16x64xf32>
    %8 = arith.addf %4, %7 : vector<2x16x64xf32>
    %cst = arith.constant 0.000000e+00 : f32
    %9 = vector.broadcast %cst : f32 to vector<2x16x64xf32>
    %10 = arith.cmpf oge, %8, %9 : vector<2x16x64xf32>
    %cst_6 = arith.constant 2.000000e-01 : f32
    %11 = vector.broadcast %cst_6 : f32 to vector<2x16x64xf32>
    %12 = arith.mulf %11, %8 : vector<2x16x64xf32>
    %13 = arith.select %10, %8, %12 : vector<2x16x64xi1>, vector<2x16x64xf32>
    %14 = arith.truncf %13 : vector<2x16x64xf32> to vector<2x16x64xbf16>
    %cst_7 = arith.constant 0.000000e+00 : f32
    %15 = vector.broadcast %cst_7 : f32 to vector<64x256xf32>
    %c0_8 = arith.constant 0 : index
    %c0_9 = arith.constant 0 : index
    %c0_10 = arith.constant 0 : index
    %16 = vector.load %arg4[%c0_8, %c0_9, %c0_10] : memref<3x32x16xbf16, #tpu.memory_space<vmem>>, vector<1x32x16xbf16>
    %17 = vector.shape_cast %16 : vector<1x32x16xbf16> to vector<32x16xbf16>
    %18 = vector.extract_strided_slice %14 {offsets = [0, 0, 0], sizes = [1, 16, 64], strides = [1, 1, 1]} : vector<2x16x64xbf16> to vector<1x16x64xbf16>
    %19 = vector.shape_cast %18 : vector<1x16x64xbf16> to vector<16x64xbf16>
    %cst_11 = arith.constant dense<0.000000e+00> : vector<32x64xf32>
    %20 = tpu.matmul %17, %19, %cst_11 {dimension_numbers = #tpu.dot_dimension_numbers<[1], [0], [0], [1], [0, 0, 1, 1], [], []>} : vector<32x16xbf16>, vector<16x64xbf16>, vector<32x64xf32> -> vector<32x64xf32>
    %c0_12 = arith.constant 0 : index
    %c0_13 = arith.constant 0 : index
    %c0_14 = arith.constant 0 : index
    %21 = vector.load %arg4[%c0_12, %c0_13, %c0_14] : memref<3x32x16xbf16, #tpu.memory_space<vmem>>, vector<1x32x16xbf16>
    %22 = vector.shape_cast %21 : vector<1x32x16xbf16> to vector<32x16xbf16>
    %23 = vector.extract_strided_slice %14 {offsets = [1, 0, 0], sizes = [1, 16, 64], strides = [1, 1, 1]} : vector<2x16x64xbf16> to vector<1x16x64xbf16>
    %24 = vector.shape_cast %23 : vector<1x16x64xbf16> to vector<16x64xbf16>
    %cst_15 = arith.constant dense<0.000000e+00> : vector<32x64xf32>
    %25 = tpu.matmul %22, %24, %cst_15 {dimension_numbers = #tpu.dot_dimension_numbers<[1], [0], [0], [1], [0, 0, 1, 1], [], []>} : vector<32x16xbf16>, vector<16x64xbf16>, vector<32x64xf32> -> vector<32x64xf32>
    %26 = tpu.concatenate %20, %25 in 0 : vector<32x64xf32>, vector<32x64xf32> -> vector<64x64xf32>
    %27 = arith.truncf %26 : vector<64x64xf32> to vector<64x64xbf16>
    %c0_16 = arith.constant 0 : index
    %c0_17 = arith.constant 0 : index
    %c0_18 = arith.constant 0 : index
    %28 = vector.load %arg5[%c0_16, %c0_17, %c0_18] : memref<3x64x256xbf16, #tpu.memory_space<vmem>>, vector<1x64x256xbf16>
    %29 = vector.shape_cast %28 : vector<1x64x256xbf16> to vector<64x256xbf16>
    %cst_19 = arith.constant dense<0.000000e+00> : vector<64x256xf32>
    %30 = tpu.matmul %27, %29, %cst_19 {dimension_numbers = #tpu.dot_dimension_numbers<[1], [0], [0], [1], [0, 0, 1, 1], [], []>} : vector<64x64xbf16>, vector<64x256xbf16>, vector<64x256xf32> -> vector<64x256xf32>
    %31 = arith.addf %15, %30 : vector<64x256xf32>
    %c1 = arith.constant 1 : index
    %c0_20 = arith.constant 0 : index
    %c0_21 = arith.constant 0 : index
    %32 = vector.load %arg4[%c1, %c0_20, %c0_21] : memref<3x32x16xbf16, #tpu.memory_space<vmem>>, vector<1x32x16xbf16>
    %33 = vector.shape_cast %32 : vector<1x32x16xbf16> to vector<32x16xbf16>
    %34 = vector.extract_strided_slice %14 {offsets = [0, 0, 0], sizes = [1, 16, 64], strides = [1, 1, 1]} : vector<2x16x64xbf16> to vector<1x16x64xbf16>
    %35 = vector.shape_cast %34 : vector<1x16x64xbf16> to vector<16x64xbf16>
    %cst_22 = arith.constant dense<0.000000e+00> : vector<32x64xf32>
    %36 = tpu.matmul %33, %35, %cst_22 {dimension_numbers = #tpu.dot_dimension_numbers<[1], [0], [0], [1], [0, 0, 1, 1], [], []>} : vector<32x16xbf16>, vector<16x64xbf16>, vector<32x64xf32> -> vector<32x64xf32>
    %c1_23 = arith.constant 1 : index
    %c0_24 = arith.constant 0 : index
    %c0_25 = arith.constant 0 : index
    %37 = vector.load %arg4[%c1_23, %c0_24, %c0_25] : memref<3x32x16xbf16, #tpu.memory_space<vmem>>, vector<1x32x16xbf16>
    %38 = vector.shape_cast %37 : vector<1x32x16xbf16> to vector<32x16xbf16>
    %39 = vector.extract_strided_slice %14 {offsets = [1, 0, 0], sizes = [1, 16, 64], strides = [1, 1, 1]} : vector<2x16x64xbf16> to vector<1x16x64xbf16>
    %40 = vector.shape_cast %39 : vector<1x16x64xbf16> to vector<16x64xbf16>
    %cst_26 = arith.constant dense<0.000000e+00> : vector<32x64xf32>
    %41 = tpu.matmul %38, %40, %cst_26 {dimension_numbers = #tpu.dot_dimension_numbers<[1], [0], [0], [1], [0, 0, 1, 1], [], []>} : vector<32x16xbf16>, vector<16x64xbf16>, vector<32x64xf32> -> vector<32x64xf32>
    %42 = tpu.concatenate %36, %41 in 0 : vector<32x64xf32>, vector<32x64xf32> -> vector<64x64xf32>
    %43 = arith.truncf %42 : vector<64x64xf32> to vector<64x64xbf16>
    %c1_27 = arith.constant 1 : index
    %c0_28 = arith.constant 0 : index
    %c0_29 = arith.constant 0 : index
    %44 = vector.load %arg5[%c1_27, %c0_28, %c0_29] : memref<3x64x256xbf16, #tpu.memory_space<vmem>>, vector<1x64x256xbf16>
    %45 = vector.shape_cast %44 : vector<1x64x256xbf16> to vector<64x256xbf16>
    %cst_30 = arith.constant dense<0.000000e+00> : vector<64x256xf32>
    %46 = tpu.matmul %43, %45, %cst_30 {dimension_numbers = #tpu.dot_dimension_numbers<[1], [0], [0], [1], [0, 0, 1, 1], [], []>} : vector<64x64xbf16>, vector<64x256xbf16>, vector<64x256xf32> -> vector<64x256xf32>
    %47 = arith.addf %31, %46 : vector<64x256xf32>
    %c2 = arith.constant 2 : index
    %c0_31 = arith.constant 0 : index
    %c0_32 = arith.constant 0 : index
    %48 = vector.load %arg4[%c2, %c0_31, %c0_32] : memref<3x32x16xbf16, #tpu.memory_space<vmem>>, vector<1x32x16xbf16>
    %49 = vector.shape_cast %48 : vector<1x32x16xbf16> to vector<32x16xbf16>
    %50 = vector.extract_strided_slice %14 {offsets = [0, 0, 0], sizes = [1, 16, 64], strides = [1, 1, 1]} : vector<2x16x64xbf16> to vector<1x16x64xbf16>
    %51 = vector.shape_cast %50 : vector<1x16x64xbf16> to vector<16x64xbf16>
    %cst_33 = arith.constant dense<0.000000e+00> : vector<32x64xf32>
    %52 = tpu.matmul %49, %51, %cst_33 {dimension_numbers = #tpu.dot_dimension_numbers<[1], [0], [0], [1], [0, 0, 1, 1], [], []>} : vector<32x16xbf16>, vector<16x64xbf16>, vector<32x64xf32> -> vector<32x64xf32>
    %c2_34 = arith.constant 2 : index
    %c0_35 = arith.constant 0 : index
    %c0_36 = arith.constant 0 : index
    %53 = vector.load %arg4[%c2_34, %c0_35, %c0_36] : memref<3x32x16xbf16, #tpu.memory_space<vmem>>, vector<1x32x16xbf16>
    %54 = vector.shape_cast %53 : vector<1x32x16xbf16> to vector<32x16xbf16>
    %55 = vector.extract_strided_slice %14 {offsets = [1, 0, 0], sizes = [1, 16, 64], strides = [1, 1, 1]} : vector<2x16x64xbf16> to vector<1x16x64xbf16>
    %56 = vector.shape_cast %55 : vector<1x16x64xbf16> to vector<16x64xbf16>
    %cst_37 = arith.constant dense<0.000000e+00> : vector<32x64xf32>
    %57 = tpu.matmul %54, %56, %cst_37 {dimension_numbers = #tpu.dot_dimension_numbers<[1], [0], [0], [1], [0, 0, 1, 1], [], []>} : vector<32x16xbf16>, vector<16x64xbf16>, vector<32x64xf32> -> vector<32x64xf32>
    %58 = tpu.concatenate %52, %57 in 0 : vector<32x64xf32>, vector<32x64xf32> -> vector<64x64xf32>
    %59 = arith.truncf %58 : vector<64x64xf32> to vector<64x64xbf16>
    %c2_38 = arith.constant 2 : index
    %c0_39 = arith.constant 0 : index
    %c0_40 = arith.constant 0 : index
    %60 = vector.load %arg5[%c2_38, %c0_39, %c0_40] : memref<3x64x256xbf16, #tpu.memory_space<vmem>>, vector<1x64x256xbf16>
    %61 = vector.shape_cast %60 : vector<1x64x256xbf16> to vector<64x256xbf16>
    %cst_41 = arith.constant dense<0.000000e+00> : vector<64x256xf32>
    %62 = tpu.matmul %59, %61, %cst_41 {dimension_numbers = #tpu.dot_dimension_numbers<[1], [0], [0], [1], [0, 0, 1, 1], [], []>} : vector<64x64xbf16>, vector<64x256xbf16>, vector<64x256xf32> -> vector<64x256xf32>
    %63 = arith.addf %47, %62 : vector<64x256xf32>
    %c0_42 = arith.constant 0 : index
    %c0_43 = arith.constant 0 : index
    %64 = vector.load %arg6[%c0_42, %c0_43] : memref<1x256xf32, #tpu.memory_space<vmem>>, vector<1x256xf32>
    %65 = vector.broadcast %64 : vector<1x256xf32> to vector<64x256xf32>
    %66 = arith.addf %63, %65 : vector<64x256xf32>
    %67 = vector.shape_cast %66 : vector<64x256xf32> to vector<2x32x256xf32>
    %c0_44 = arith.constant 0 : index
    %c0_45 = arith.constant 0 : index
    %c0_46 = arith.constant 0 : index
    %68 = vector.load %arg7[%c0_44, %c0_45, %c0_46] : memref<2x32x256xf32, #tpu.memory_space<vmem>>, vector<2x32x256xf32>
    tpu.vector_store %arg7[%c0_44, %c0_45, %c0_46], %67 {strides = array<i32>} : memref<2x32x256xf32, #tpu.memory_space<vmem>>, vector<2x32x256xf32>,
    %cst_47 = arith.constant dense<0.000000e+00> : vector<256xf32>
    %69 = vector.multi_reduction <add>, %66, %cst_47 [0] : vector<64x256xf32> to vector<256xf32>
    %70 = vector.shape_cast %69 : vector<256xf32> to vector<1x256xf32>
    %c0_48 = arith.constant 0 : index
    %c0_49 = arith.constant 0 : index
    %c0_50 = arith.constant 0 : index
    %71 = vector.load %arg8[%c0_48, %c0_49, %c0_50] : memref<1x1x256xf32, #tpu.memory_space<vmem>>, vector<1x1x256xf32>
    %72 = vector.shape_cast %71 : vector<1x1x256xf32> to vector<1x256xf32>
    %73 = vector.shape_cast %70 : vector<1x256xf32> to vector<1x1x256xf32>
    tpu.vector_store %arg8[%c0_48, %c0_49, %c0_50], %73 {strides = array<i32>} : memref<1x1x256xf32, #tpu.memory_space<vmem>>, vector<1x1x256xf32>,
    %74 = arith.mulf %66, %66 : vector<64x256xf32>
    %cst_51 = arith.constant dense<0.000000e+00> : vector<256xf32>
    %75 = vector.multi_reduction <add>, %74, %cst_51 [0] : vector<64x256xf32> to vector<256xf32>
    %76 = vector.shape_cast %75 : vector<256xf32> to vector<1x256xf32>
    %c0_52 = arith.constant 0 : index
    %c0_53 = arith.constant 0 : index
    %c0_54 = arith.constant 0 : index
    %77 = vector.load %arg9[%c0_52, %c0_53, %c0_54] : memref<1x1x256xf32, #tpu.memory_space<vmem>>, vector<1x1x256xf32>
    %78 = vector.shape_cast %77 : vector<1x1x256xf32> to vector<1x256xf32>
    %79 = vector.shape_cast %76 : vector<1x256xf32> to vector<1x1x256xf32>
    tpu.vector_store %arg9[%c0_52, %c0_53, %c0_54], %79 {strides = array<i32>} : memref<1x1x256xf32, #tpu.memory_space<vmem>>, vector<1x1x256xf32>,
    return
  }
  func.func @transform_0(%arg0: i32) -> (i32, i32, i32) {
    %c0_i32 = arith.constant 0 : i32
    %c0_i32_0 = arith.constant 0 : i32
    %c0_i32_1 = arith.constant 0 : i32
    return %arg0, %c0_i32, %c0_i32_0 : i32, i32, i32
  }
  func.func @transform_1(%arg0: i32) -> (i32, i32) {
    %c0_i32 = arith.constant 0 : i32
    %c0_i32_0 = arith.constant 0 : i32
    %c0_i32_1 = arith.constant 0 : i32
    return %c0_i32, %c0_i32_0 : i32, i32
  }
  func.func @transform_2(%arg0: i32) -> (i32, i32) {
    %c0_i32 = arith.constant 0 : i32
    %c0_i32_0 = arith.constant 0 : i32
    %c0_i32_1 = arith.constant 0 : i32
    return %c0_i32, %c0_i32_0 : i32, i32
  }
  func.func @transform_3(%arg0: i32) -> (i32, i32, i32) {
    %c0_i32 = arith.constant 0 : i32
    %c0_i32_0 = arith.constant 0 : i32
    %c0_i32_1 = arith.constant 0 : i32
    %c0_i32_2 = arith.constant 0 : i32
    return %c0_i32, %c0_i32_0, %c0_i32_1 : i32, i32, i32
  }
  func.func @transform_4(%arg0: i32) -> (i32, i32, i32) {
    %c0_i32 = arith.constant 0 : i32
    %c0_i32_0 = arith.constant 0 : i32
    %c0_i32_1 = arith.constant 0 : i32
    %c0_i32_2 = arith.constant 0 : i32
    return %c0_i32, %c0_i32_0, %c0_i32_1 : i32, i32, i32
  }
  func.func @transform_5(%arg0: i32) -> (i32, i32) {
    %c0_i32 = arith.constant 0 : i32
    %c0_i32_0 = arith.constant 0 : i32
    %c0_i32_1 = arith.constant 0 : i32
    return %c0_i32, %c0_i32_0 : i32, i32
  }
  func.func @transform_6(%arg0: i32) -> (i32, i32, i32) {
    %c0_i32 = arith.constant 0 : i32
    %c0_i32_0 = arith.constant 0 : i32
    %c0_i32_1 = arith.constant 0 : i32
    return %arg0, %c0_i32, %c0_i32_0 : i32, i32, i32
  }
  func.func @transform_7(%arg0: i32) -> (i32, i32, i32) {
    %c0_i32 = arith.constant 0 : i32
    %c0_i32_0 = arith.constant 0 : i32
    %c0_i32_1 = arith.constant 0 : i32
    return %arg0, %c0_i32, %c0_i32_0 : i32, i32, i32
  }
  func.func @transform_8(%arg0: i32) -> (i32, i32, i32) {
    %c0_i32 = arith.constant 0 : i32
    %c0_i32_0 = arith.constant 0 : i32
    %c0_i32_1 = arith.constant 0 : i32
    return %arg0, %c0_i32, %c0_i32_0 : i32, i32, i32
  }
}

</mosaic_0001>

<bundles_post_ra>
// kernel: tpu_custom_call.1
= control target key start
LH: loop header
LB: loop body
LE: loop exit
PB: predicated region body
PF: predicated region fallthrough
CT: control target
= control target key end

     0   :  { %6 = vsyncpa [#allocation3], 0  ;;  %s448_s0 = inlined_call_operand.hbm [shape: f32[8,128], index: 0, kind: input, shape index: {}]   ;;  %s449_s1 = inlined_call_operand.hbm [shape: f32[16,128], index: 1, kind: output, shape index: {}]  }
   0x1   :  { %7 = vsyncpa [#allocation4], 0 }
   0x2   :  { %9 = vsyncpa [#allocation4 + $0x1], 0  ;;  %s348_s6 = smov 0   ;;  %s350_s7 = smov 0  }
   0x3   :  { %s352_s8 = smov 0   ;;  %s354_s9 = smov 0  }
   0x4 LB: > { %s369_s10 = sadd.s32 4294967295, %s334_s9   ;;  %s184_s11 = sadd.s32 4294967294, %s334_s9   ;;  %s334_s9 = sphi %s354_s9, %s457_s9   ;;  %s330_s8 = sphi %s352_s8, %s456_s8   ;;  %s326_s7 = sphi %s350_s7, %s455_s7   ;;  %s322_s6 = sphi %s348_s6, %s454_s6  }
   0x5   : > { %s373_s12 = sadd.s32 1, %s334_s9   ;;  %s43_s13 = sadd.s32 1, %s330_s8 }
   0x6   : > { %s40_s14 = ssub.s32 %s334_s9, %s373_s12  ;;  %p53_p0 = scmp.ne.s32.totalorder %s330_s8, %s326_s7 }
   0x7   : > { %p41_p1 = scmp.eq.s32.totalorder %s40_s14, 0  ;;  %p54_p2 = scmp.eq.s32.totalorder %s369_s10, 1 }
   0x8   : > { %p59_p3 = scmp.ne.s32.totalorder %s326_s7, %s322_s6  ;;  %p60_p4 = scmp.eq.s32.totalorder %s184_s11, 1 }
   0x9   : > { %s384_s15 = scalar_select %p41_p1, %s330_s8, %s43_s13  }
   0xa   : > { %p386_p5 = por %p54_p2, %p53_p0  ;;  %p390_p6 = por %p60_p4, %p59_p3 }
   0xb   : > { %p185_p7 = scmp.ge.s32.totalorder %s334_s9, 1  ;;  %p67_p8 = scmp.lt.s32.totalorder %s334_s9, 3 }
   0xc   : > { %s451_s17 = scalar_select %p390_p6, 1, 0 }
   0xd   : > { %p208_p9 = scmp.eq.s32.totalorder %s369_s10, 0  ;;  %p397_p10 = pnand %p185_p7, %p67_p8 }
   0xe   : > { %s336_s19 = smov [#allocation2]  }
   0xf   : > { %s80_s20 = sshll.u32 %s336_s19, 4  ;;  %p200_p11 = pneg %p397_p10  ;;  %s81_s20 = int_to_ptr.vmem [resolvable:$true] %s80_s20 }
  0x10   : > { %s255_s21 = scalar_lea.vmem %s81_s20, 128  ;;  %p263_p3 = scmp.lt.s32.totalorder %s81_s20, %s81_s20 }
  0x11   : > { %p201_p12 = pnand %p208_p9, %p200_p11  ;;  %p256_p0 = scmp.ne.s32.totalorder %s81_s20, %s255_s21 }
  0x12   : > { %p264_p4 = scmp.lt.s32.totalorder %s255_s21, %s255_s21 }
  0x13   : > { %p246_p13 = pneg %p201_p12 }
  0x14   : > { %p265_p6 = por %p264_p4, %p263_p3 }
  0x15   : > { %p258_p1 = pnand %p256_p0, %p246_p13 }
  0x17   : > { %p259_p2 = pneg %p258_p1 }
  0x19   : > { %p266_p7 = pnand %p265_p6, %p259_p2 }
  0x1b   : > { %269 = shalt.err (!%p266_p7)
}
  0x1c   : > { %203 = dma.hbm_to_vmem [thread:$0]  (!%p201_p12), %s448_s0, 128, %s81_s20, [#allocation3]  }
  0x1d   : > { %93 = sbr.rel (%p397_p10) target bundleno = 60 (0x3c), region = 24 }
  0x22   : > { %313 = dma.done.wait (%p208_p9), [#allocation3], 128  }
  0x23   : > { %315 = vsyncadd (%p208_p9), [#allocation3], 4294967168  ;;  %s105_s24 = sand.u32 1, %s326_s7   ;;  %s191_s28 = sshll.u32 %s369_s10, 7  ;;  %v108_v0 = vld [vmem:[#allocation2] sm:$0xff] }
  0x24   : > { %s189_s25 = sshll.u32 %s105_s24, 3  ;;  %v109_v1 = vadd.f32 1.0, %v108_v0  ;;  %s123_s2 = scalar_lea.hbm %s449_s1, %s191_s28 }
  0x25   : > { %s107_s26 = scalar_lea.vmem [#allocation5], %s189_s25  ;;  %s112_s3 = scalar_lea.sflag [#allocation4], %s105_s24 }
  0x26   : > { %s125_s27 = sshll.u32 %s107_s26, 4  ;;  %110 = vst [vmem:[%s107_s26] sm:$0xff] %v109_v1  ;;  %s337_s5 = smov [#allocation5]   ;;  %s126_s27 = int_to_ptr.vmem [resolvable:$true] %s125_s27 }
  0x27   : > { %s270_s4 = scalar_lea.vmem %s126_s27, 128  ;;  %s274_s11 = sshll.u32 %s337_s5, 4  ;;  %s275_s11 = int_to_ptr.vmem [resolvable:$false] %s274_s11 }
  0x28   : > { %p271_p6 = scmp.ne.s32.totalorder %s126_s27, %s270_s4  ;;  %s276_s13 = scalar_lea.vmem %s275_s11, 256 }
  0x29   : > { %p277_p10 = scmp.lt.s32.totalorder %s126_s27, %s275_s11  ;;  %p278_p11 = scmp.lt.s32.totalorder %s276_s13, %s270_s4 }
  0x2a   : > { %p272_p8 = pnand %p271_p6, %p386_p5 }
  0x2b   : > { %p279_p12 = por %p278_p11, %p277_p10 }
  0x2c   : > { %p273_p9 = pneg %p272_p8 }
  0x2e   : > { %p280_p13 = pnand %p279_p12, %p273_p9 }
  0x30   : > { %283 = shalt.err (!%p280_p13)
}
  0x31   : > { %s284_s10 = scalar_lea.hbm %s123_s2, 128  ;;  %s288_s19 = scalar_lea.hbm %s449_s1, 256 }
  0x32   : > { %p285_p0 = scmp.ne.s32.totalorder %s123_s2, %s284_s10  ;;  %p289_p3 = scmp.lt.s32.totalorder %s123_s2, %s449_s1 }
  0x33   : > { %p290_p4 = scmp.lt.s32.totalorder %s288_s19, %s284_s10 }
  0x34   : > { %p286_p1 = pnand %p285_p0, %p386_p5 }
  0x35   : > { %p291_p7 = por %p290_p4, %p289_p3 }
  0x36   : > { %p287_p2 = pneg %p286_p1 }
  0x38   : > { %p292_p6 = pnand %p291_p7, %p287_p2 }
  0x3a   : > { %295 = shalt.err (!%p292_p6)
}
  0x3b   : > { %198 = dma.vmem_to_hbm [thread:$0]  (%p386_p5), %s126_s27, 128, %s123_s2, %s112_s3  }
  0x3c PF: > { %p210_p8 = scmp.ge.s32.totalorder %s334_s9, 2  ;;  %s137_s22 = sand.u32 1, %s322_s6  }
  0x3d   : > { %p453_p9 = scmp.ne.s32.totalorder %s451_s17, 0  ;;  %s138_s23 = scalar_lea.sflag [#allocation4], %s137_s22 }
  0x3f   : > { %p205_p10 = pnand %p210_p8, %p453_p9 }
  0x41   : > { %p206_p11 = pneg %p205_p10 }
  0x43   : > { %317 = dma.done.wait (%p206_p11), %s138_s23, 128  }
  0x44   : > { %319 = vsyncadd (%p206_p11), %s138_s23, 4294967168  ;;  %p12_p12 = scmp.ge.s32.totalorder %s373_s12, 4   ;;  %s454_s6 = smov %s326_s7 }
  0x45   : > { %s455_s7 = smov %s330_s8  ;;  %s456_s8 = smov %s384_s15 }
  0x46   : > { %s457_s9 = smov %s373_s12  ;;  %14 = sbr.rel (!%p12_p12) target bundleno = 4 (0x4), region = 61 }
  0x4b   :  { %143 = vsyncpa [#allocation3], 1 }
  0x4c   :  { %145 = vsyncpa [#allocation3 + $0x1], 1 }
  0x4d   :  { %146 = vsyncpa [#allocation4], 1 }
  0x4e   :  { %148 = vsyncpa [#allocation4 + $0x1], 1 }

// kernel: tpu_custom_call.1
= control target key start
LH: loop header
LB: loop body
LE: loop exit
PB: predicated region body
PF: predicated region fallthrough
CT: control target
= control target key end

     0   :  { %s2336_s0 = inlined_call_operand.vmem [shape: f32[4,16,64], index: 0, kind: input, shape index: {}]   ;;  %s2337_s1 = inlined_call_operand.vmem [shape: f32[1,64], index: 1, kind: input, shape index: {}]   ;;  %s2338_s2 = inlined_call_operand.vmem [shape: f32[1,64], index: 2, kind: input, shape index: {}]   ;;  %s2339_s3 = inlined_call_operand.vmem [shape: bf16[3,32,16], index: 3, kind: input, shape index: {}]   ;;  %s2340_s4 = inlined_call_operand.hbm [shape: bf16[3,64,256], index: 4, kind: input, shape index: {}]   ;;  %s2341_s5 = inlined_call_operand.vmem [shape: f32[1,256], index: 5, kind: input, shape index: {}]   ;;  %s2342_s6 = inlined_call_operand.hbm [shape: f32[4,32,256], index: 6, kind: output, shape index: {0}]   ;;  %s2343_s7 = inlined_call_operand.hbm [shape: f32[2,1,256], index: 7, kind: output, shape index: {1}]   ;;  %s2344_s8 = inlined_call_operand.hbm [shape: f32[2,1,256], index: 8, kind: output, shape index: {2}]  }
   0x1   :  { %2346 = sst [smem:[#allocation12_spill]] %s2336_s0 }
   0x2   :  { %14 = vsyncpa [#allocation3], 0 }
   0x3   :  { %15 = vsyncpa [#allocation4], 0 }
   0x4   :  { %17 = vsyncpa [#allocation4 + $0x1], 0 }
   0x5   :  { %18 = vsyncpa [#allocation7], 0 }
   0x6   :  { %20 = vsyncpa [#allocation7 + $0x1], 0  ;;  %s1979_s27 = smov 0   ;;  %s1981_s28 = smov 0  }
   0x7   :  { %s1983_s29 = smov 0   ;;  %s1985_s30 = smov 0  }
   0x8 LB: > { %s2000_s9 = sadd.s32 4294967295, %s1922_s30   ;;  %s2345_s10 = sadd.s32 4294967294, %s1922_s30   ;;  %s1922_s30 = sphi %s1985_s30, %s2358_s30   ;;  %s1918_s29 = sphi %s1983_s29, %s2357_s29   ;;  %s1914_s28 = sphi %s1981_s28, %s2356_s28   ;;  %s1910_s27 = sphi %s1979_s27, %s2355_s27  }
   0x9   : > { %s2004_s11 = sadd.s32 1, %s1922_s30   ;;  %s164_s12 = sadd.s32 1, %s1918_s29 }
   0xa   : > { %s161_s13 = ssub.s32 %s1922_s30, %s2004_s11  ;;  %p174_p0 = scmp.ne.s32.totalorder %s1918_s29, %s1914_s28 }
   0xb   : > { %p162_p1 = scmp.eq.s32.totalorder %s161_s13, 0  ;;  %p175_p2 = scmp.eq.s32.totalorder %s2000_s9, 1 }
   0xc   : > { %p180_p3 = scmp.ne.s32.totalorder %s1914_s28, %s1910_s27  ;;  %p181_p4 = scmp.eq.s32.totalorder %s2345_s10, 1 }
   0xd   : > { %s2017_s14 = scalar_select %p162_p1, %s1918_s29, %s164_s12  }
   0xe   : > { %p2019_p5 = por %p175_p2, %p174_p0  ;;  %p2023_p6 = por %p181_p4, %p180_p3 }
   0xf   : > { %p1514_p7 = scmp.ge.s32.totalorder %s1922_s30, 1  ;;  %p240_p8 = scmp.lt.s32.totalorder %s1922_s30, 3 }
  0x10   : > { %s2348_s16 = scalar_select %p2023_p6, 1, 0 }
  0x11   : > { %p1692_p9 = scmp.eq.s32.totalorder %s2000_s9, 0  ;;  %p2030_p10 = pnand %p1514_p7, %p240_p8 }
  0x12   : > { %s1924_s18 = smov [#allocation2]  }
  0x13   : > { %s261_s19 = sshll.u32 %s1924_s18, 4  ;;  %p1678_p11 = pneg %p2030_p10  ;;  %s262_s19 = int_to_ptr.vmem [resolvable:$true] %s261_s19 }
  0x14   : > { %s1787_s20 = scalar_lea.vmem %s262_s19, 3072  ;;  %p1795_p3 = scmp.lt.s32.totalorder %s262_s19, %s262_s19 }
  0x15   : > { %p1679_p12 = pnand %p1692_p9, %p1678_p11  ;;  %p1788_p0 = scmp.ne.s32.totalorder %s262_s19, %s1787_s20 }
  0x16   : > { %p1796_p4 = scmp.lt.s32.totalorder %s1787_s20, %s1787_s20 }
  0x17   : > { %p1778_p13 = pneg %p1679_p12 }
  0x18   : > { %p1797_p6 = por %p1796_p4, %p1795_p3 }
  0x19   : > { %p1790_p1 = pnand %p1788_p0, %p1778_p13 }
  0x1b   : > { %p1791_p2 = pneg %p1790_p1 }
  0x1d   : > { %p1798_p7 = pnand %p1797_p6, %p1791_p2 }
  0x1f   : > { %1801 = shalt.err (!%p1798_p7)
}
  0x20   : > { %s1925_s21 = smov 128   ;;  %s1926_s22 = smov 8  }
  0x21   : > { %1681 = dma.hbm_to_vmem [thread:$0]  (!%p1679_p12), %s2340_s4, 3072, %s262_s19, [#allocation3], %s1925_s21, %s1925_s21, %s1926_s22  }
  0x22   : > { %290 = sbr.rel (%p2030_p10) target bundleno = 802 (0x322), region = 44 }
  0x27   : > { %1897 = dma.done.wait (%p1692_p9), [#allocation3], 3072  }
  0x28   : > { %1899 = vsyncadd (%p1692_p9), [#allocation3], 4294964224  ;;  %s1522_s25 = sshll.u32 %s2000_s9, 1  ;;  %s2350_s0 = sld [smem:[#allocation12_spill]]  ;;  %v1525_v2 = vld [vmem:[%s2337_s1] ss:$0 sm:$0xff] }
  0x29   : > { %p336_p8 = scmp.lt.s32.totalorder %s1522_s25, 3  ;;  %v1526_v5 = vld [vmem:[%s2338_s2] ss:$0 sm:$0xff]  ;;  %vm398_vm0 = vcmask 130048   ;;  %v1735_v25 = vld [vmem:[%s2339_s3 + $0x8] sm:$0xff]   ;;  %v1736_v26 = vld [vmem:[%s2339_s3 + $0x10] sm:$0xff]  }
  0x2a   : > { %v1734_v10 = vld [vmem:[%s2339_s3] sm:$0xff]   ;;  %v1740_v27 = vld [vmem:[#allocation2 + $0x74] ss:$8 sps:$4 sm:$0xff]   ;;  %v1738_v29 = vld [vmem:[#allocation2 + $0x70] ss:$8 sps:$4 sm:$0xff]   ;;  %v1927_v36 = vmov 0  }
  0x2b   : > { %s2360_s25 = smov (!%p336_p8, %s1522_s25), 3  ;;  %1626 = vmatprep.mubr.msk.bf16.mxu0 %vm398_vm0, %v1734_v10  ;;  %1632 = vmatprep.mubr.msk.bf16.mxu1 %vm398_vm0, %v1734_v10  ;;  %v1737_v28 = vld [vmem:[%s2339_s3 + $0x18] sm:$0xff]   ;;  %v1743_v30 = vld [vmem:[#allocation2 + $0x64] ss:$8 sps:$4 sm:$0xff]   ;;  %v1741_v31 = vld [vmem:[#allocation2 + $0x60] ss:$8 sps:$4 sm:$0xff]  }
  0x2c   : > { %s1601_s26 = sshll.u32 %s2360_s25, 4  ;;  %v1746_v32 = vld [vmem:[#allocation2 + $0x54] ss:$8 sps:$4 sm:$0xff]   ;;  %v1744_v33 = vld [vmem:[#allocation2 + $0x50] ss:$8 sps:$4 sm:$0xff]   ;;  %vm687_vm5 = vcmask 523264  }
  0x2d   : > { %v1749_v34 = vld [vmem:[#allocation2 + $0x44] ss:$8 sps:$4 sm:$0xff]   ;;  %v1747_v35 = vld [vmem:[#allocation2 + $0x40] ss:$8 sps:$4 sm:$0xff]   ;;  %v1752_v37 = vld [vmem:[#allocation2 + $0x34] ss:$8 sps:$4 sm:$0xff]  }
  0x2e   : > { %s340_s18 = scalar_lea.vmem %s2350_s0, %s1601_s26  ;;  %v1750_v51 = vld [vmem:[#allocation2 + $0x30] ss:$8 sps:$4 sm:$0xff]   ;;  %v1755_v53 = vld [vmem:[#allocation2 + $0x24] ss:$8 sps:$4 sm:$0xff]   ;;  %v1753_v58 = vld [vmem:[#allocation2 + $0x20] ss:$8 sps:$4 sm:$0xff]  }
  0x2f   : > { %v344_v0 = vld [vmem:[%s340_s18] sm:$0xff]  ;;  %v345_v1 = vld [vmem:[%s340_s18 + $0x8] sm:$0xff]  ;;  %v346_v6 = vld [vmem:[%s340_s18 + $0x10] sm:$0xff]  ;;  %s2154_s22 = sand.u32 1, %s1914_s28   ;;  %s1603_s12 = sshll.u32 %s2000_s9, 11 }
  0x30   : > { %v355_v3 = vmul.f32 %v1525_v2, %v344_v0  ;;  %v356_v4 = vmul.f32 %v1525_v2, %v345_v1  ;;  %v347_v7 = vld [vmem:[%s340_s18 + $0x18] sm:$0xff]  ;;  %v357_v8 = vmul.f32 %v1525_v2, %v346_v6  ;;  %v1756_v56 = vld [vmem:[%s2339_s3 + $0x20] sm:$0xff]   ;;  %v1757_v63 = vld [vmem:[%s2339_s3 + $0x28] sm:$0xff]   ;;  %s1519_s25 = sshll.u32 %s2154_s22, 7  ;;  %s2213_s17 = scalar_lea.hbm %s2342_s6, %s1603_s12 }
  0x31   : > { %v358_v9 = vmul.f32 %v1525_v2, %v347_v7  ;;  %v1760_v59 = vld [vmem:[#allocation2 + $0x14] ss:$8 sps:$4 sm:$0xff]   ;;  %v1758_v61 = vld [vmem:[#allocation2 + $0x10] ss:$8 sps:$4 sm:$0xff]   ;;  %v1763_v0 = vld [vmem:[#allocation2 + $0x4] ss:$8 sps:$4 sm:$0xff]  }
  0x32   : > { %v366_v11 = vadd.f32 %v1526_v5, %v355_v3  ;;  %v367_v12 = vadd.f32 %v1526_v5, %v356_v4  ;;  %v368_v13 = vadd.f32 %v1526_v5, %v357_v8  ;;  %v1761_v1 = vld [vmem:[#allocation2] ss:$8 sps:$4 sm:$0xff]   ;;  %v1764_v7 = vld [vmem:[#allocation2 + $0xb0] ss:$8 sps:$4 sm:$0xff]   ;;  %v1766_v8 = vld [vmem:[#allocation2 + $0xb4] ss:$8 sps:$4 sm:$0xff]  }
  0x33   : > { %v369_v14 = vadd.f32 %v1526_v5, %v358_v9  ;;  %v1767_v9 = vld [vmem:[#allocation2 + $0xa0] ss:$8 sps:$4 sm:$0xff]   ;;  %v1769_v10 = vld [vmem:[#allocation2 + $0xa4] ss:$8 sps:$4 sm:$0xff]   ;;  %s2166_s26 = scalar_lea.vmem [#allocation5], %s1519_s25  ;;  %s1326_s20 = scalar_lea.sflag [#allocation4], %s2154_s22 }
  0x34   : > { %vm370_vm1 = vcmp.ge.f32.partialorder %v366_v11, 0.0  ;;  %vm371_vm2 = vcmp.ge.f32.partialorder %v367_v12, 0.0  ;;  %v374_v15 = vmul.f32 0.2, %v366_v11  ;;  %v375_v16 = vmul.f32 0.2, %v367_v12 }
  0x35   : > { %vm372_vm3 = vcmp.ge.f32.partialorder %v368_v13, 0.0  ;;  %vm373_vm4 = vcmp.ge.f32.partialorder %v369_v14, 0.0  ;;  %v376_v17 = vmul.f32 0.2, %v368_v13  ;;  %v377_v18 = vmul.f32 0.2, %v369_v14 }
  0x36   : > { %v378_v19 = vsel %vm370_vm1, %v366_v11, %v374_v15  ;;  %v379_v20 = vsel %vm371_vm2, %v367_v12, %v375_v16  ;;  %v1770_v11 = vld [vmem:[#allocation2 + $0x90] ss:$8 sps:$4 sm:$0xff]   ;;  %v1772_v12 = vld [vmem:[#allocation2 + $0x94] ss:$8 sps:$4 sm:$0xff]   ;;  %s1350_s13 = sshll.u32 %s2166_s26, 4  ;;  %s1928_s23 = smov [#allocation5]   ;;  %s2215_s13 = int_to_ptr.vmem [resolvable:$true] %s1350_s13 }
  0x37   : > { %v2062_v21 = vpack.c.bf16 %v379_v20, %v378_v19  ;;  %v380_v22 = vsel %vm372_vm3, %v368_v13, %v376_v17  ;;  %v381_v23 = vsel %vm373_vm4, %v369_v14, %v377_v18  ;;  %v1775_v13 = vld [vmem:[#allocation2 + $0x84] ss:$8 sps:$4 sm:$0xff]   ;;  %v1773_v14 = vld [vmem:[#allocation2 + $0x80] ss:$8 sps:$4 sm:$0xff]   ;;  %s1802_s21 = scalar_lea.vmem %s2215_s13, 2048  ;;  %s1806_s24 = sshll.u32 %s1928_s23, 4  ;;  %s1807_s24 = int_to_ptr.vmem [resolvable:$false] %s1806_s24 }
  0x38   : > { %v2064_v24 = vpack.c.bf16 %v381_v23, %v380_v22  ;;  %p1803_p6 = scmp.ne.s32.totalorder %s2215_s13, %s1802_s21  ;;  %s1808_s25 = scalar_lea.vmem %s1807_s24, 4096 }
  0x39   : > { %1624 = vmatprep.subr.bf16.mxu0 %v2062_v21  ;;  %p1809_p11 = scmp.lt.s32.totalorder %s2215_s13, %s1807_s24  ;;  %p1810_p12 = scmp.lt.s32.totalorder %s1808_s25, %s1802_s21 }
  0x3a   : > { %1625 = vmatpush3.bf16.msra.mxu0 %v2062_v21  ;;  %1630 = vmatprep.subr.bf16.mxu1 %v2064_v24  ;;  %p1804_p9 = pnand %p1803_p6, %p2019_p5 }
  0x3b   : > { %1631 = vmatpush3.bf16.msra.mxu1 %v2064_v24  ;;  %1636 = vmatprep.subr.bf16.mxu0 %v2062_v21  ;;  %p1811_p13 = por %p1810_p12, %p1809_p11 }
  0x3c   : > { %1642 = vmatprep.subr.bf16.mxu1 %v2064_v24  ;;  %p1805_p10 = pneg %p1804_p9 }
  0x3d   : > { %1627 = vmatmul.mubr.msk.bf16.vlgmr.msra.gmra.mxu0 %vm398_vm0, %v1735_v25 }
  0x3e   : > { %1633 = vmatmul.mubr.msk.bf16.vlgmr.msra.gmra.mxu1 %vm398_vm0, %v1735_v25  ;;  %1637 = vmatpush3.bf16.msra.mxu0 %v2062_v21  ;;  %p1812_p0 = pnand %p1811_p13, %p1805_p10 }
  0x3f   : > { %1643 = vmatpush3.bf16.msra.mxu1 %v2064_v24  ;;  %1638 = vmatprep.mubr.msk.bf16.mxu0 %vm398_vm0, %v1736_v26 }
  0x40   : > { %1644 = vmatprep.mubr.msk.bf16.mxu1 %vm398_vm0, %v1736_v26  ;;  %1660 = vmatprep.subr.bf16.mxu1 %v1740_v27 }
  0x41   : > { %708 = vmatprep.subr.bf16.mxu0 %v1740_v27 }
  0x45   : > { %1639 = vmatmul.mubr.msk.bf16.vlgmr.msra.gmra.mxu0 %vm398_vm0, %v1737_v28 }
  0x46   : > { %1645 = vmatmul.mubr.msk.bf16.vlgmr.msra.gmra.mxu1 %vm398_vm0, %v1737_v28  ;;  %709 = vmatpush1.bf16.msra.mxu0 %v1738_v29 }
  0x47   : > { %1664 = vmatpush1.bf16.msra.mxu1 %v1738_v29  ;;  %710 = vmatprep.subr.bf16.mxu0 %v1743_v30 }
  0x48   : > { %1661 = vmatprep.subr.bf16.mxu1 %v1743_v30  ;;  %742 = vmatprep.mubr.bf16.mxu1 %v1927_v36 }
  0x49   : > { %732 = vmatprep.mubr.bf16.mxu0 %v1927_v36 }
  0x4a   : > { %711 = vmatpush1.bf16.msra.mxu0 %v1741_v31 }
  0x4b   : > { %1665 = vmatpush1.bf16.msra.mxu1 %v1741_v31  ;;  %712 = vmatprep.subr.bf16.mxu0 %v1746_v32 }
  0x4c   : > { %1662 = vmatprep.subr.bf16.mxu1 %v1746_v32 }
  0x4e   : > { %713 = vmatpush1.bf16.msra.mxu0 %v1744_v33 }
  0x4f   : > { %1666 = vmatpush1.bf16.msra.mxu1 %v1744_v33  ;;  %714 = vmatprep.subr.bf16.mxu0 %v1749_v34 }
  0x50   : > { %1663 = vmatprep.subr.bf16.mxu1 %v1749_v34 }
  0x52   : > { %715 = vmatpush1.bf16.msra.mxu0 %v1747_v35 }
  0x53   : > { %1667 = vmatpush1.bf16.msra.mxu1 %v1747_v35  ;;  %1648 = vmatprep.subr.bf16.mxu0 %v2062_v21 }
  0x54   : > { %833 = vmatprep.subr.bf16.mxu1 %v1752_v37 }
  0xfd   : > { %v1628_v38 = vpop.f32.mrf.mxu0 }
  0xfe   : > { %v1634_v39 = vpop.f32.mrf.mxu1 }
  0xff   : > { %v439_v40 = vpop.f32.mrf.mxu0 }
 0x100   : > { %v488_v41 = vpop.f32.mrf.mxu1 }
 0x101   : > { %v1629_v42 = vpop.f32.mrf.mxu0 }
 0x102   : > { %v1635_v43 = vpop.f32.mrf.mxu1  ;;  %v504_v4 = vpack.c.bf16 %v1629_v42, %v1628_v38 }
 0x103   : > { %v442_v44 = vpop.f32.mrf.mxu0  ;;  %v506_v6 = vpack.c.bf16 %v1635_v43, %v1634_v39 }
 0x104   : > { %v491_v45 = vpop.f32.mrf.mxu1  ;;  %v503_v3 = vpack.c.bf16 %v442_v44, %v439_v40 }
 0x105   : > { %v1640_v46 = vpop.f32.mrf.mxu0  ;;  %v505_v5 = vpack.c.bf16 %v491_v45, %v488_v41 }
 0x106   : > { %v1646_v47 = vpop.f32.mrf.mxu1 }
 0x107   : > { %v570_v48 = vpop.f32.mrf.mxu0 }
 0x108   : > { %v619_v49 = vpop.f32.mrf.mxu1 }
 0x109   : > { %v1641_v50 = vpop.f32.mrf.mxu0 }
 0x10a   : > { %v635_v52 = vpack.c.bf16 %v1641_v50, %v1640_v46  ;;  %v1647_v54 = vpop.f32.mrf.mxu1 }
 0x10b   : > { %v573_v55 = vpop.f32.mrf.mxu0  ;;  %v637_v2 = vpack.c.bf16 %v1647_v54, %v1646_v47 }
 0x10c   : > { %v634_v57 = vpack.c.bf16 %v573_v55, %v570_v48  ;;  %1552 = vmatmul.mubr.msk.bf16.vlgmr.msra.gmra.mxu1 %vm687_vm5, %v635_v52  ;;  %v622_v60 = vpop.f32.mrf.mxu1 }
 0x10d   : > { %834 = vmatpush1.bf16.msra.mxu1 %v1750_v51  ;;  %752 = vmatprep.mubr.bf16.mxu1 %v1927_v36  ;;  %v636_v62 = vpack.c.bf16 %v622_v60, %v619_v49 }
 0x10e   : > { %1551 = vmatmul.mubr.msk.bf16.vlgmr.msra.gmra.mxu0 %vm687_vm5, %v634_v57  ;;  %835 = vmatprep.subr.bf16.mxu1 %v1755_v53 }
 0x10f   : > { %1649 = vmatpush3.bf16.msra.mxu0 %v2062_v21  ;;  %1650 = vmatprep.mubr.msk.bf16.mxu0 %vm398_vm0, %v1756_v56 }
 0x110   : > { %1090 = vmatprep.subr.bf16.mxu0 %v1766_v8 }
 0x111   : > { %836 = vmatpush1.bf16.msra.mxu1 %v1753_v58 }
 0x112   : > { %837 = vmatprep.subr.bf16.mxu1 %v1760_v59 }
 0x114   : > { %1553 = vmatmul.mubr.msk.bf16.gmra.mxu1 %vm687_vm5, %v636_v62 }
 0x115   : > { %838 = vmatpush1.bf16.msra.mxu1 %v1758_v61  ;;  %762 = vmatprep.mubr.bf16.mxu1 %v1927_v36 }
 0x116   : > { %1651 = vmatmul.mubr.msk.bf16.vlgmr.msra.gmra.mxu0 %vm398_vm0, %v1757_v63  ;;  %839 = vmatprep.subr.bf16.mxu1 %v1763_v0 }
 0x117   : > { %1114 = vmatprep.mubr.bf16.mxu0 %v1927_v36  ;;  %1091 = vmatpush1.bf16.msra.mxu0 %v1764_v7 }
 0x118   : > { %1092 = vmatprep.subr.bf16.mxu0 %v1769_v10 }
 0x119   : > { %840 = vmatpush1.bf16.msra.mxu1 %v1761_v1 }
 0x11a   : > { %1654 = vmatprep.subr.bf16.mxu1 %v2064_v24 }
 0x11b   : > { %1093 = vmatpush1.bf16.msra.mxu0 %v1767_v9 }
 0x11c   : > { %1554 = vmatmul.mubr.msk.bf16.gmra.mxu1 %vm687_vm5, %v637_v2  ;;  %1094 = vmatprep.subr.bf16.mxu0 %v1772_v12  ;;  %v1173_v12 = vlaneseq }
 0x11d   : > { %857 = vmatprep.mubr.bf16.mxu1 %v1927_v36 }
 0x11f   : > { %1095 = vmatpush1.bf16.msra.mxu0 %v1770_v11 }
 0x120   : > { %1096 = vmatprep.subr.bf16.mxu0 %v1775_v13  ;;  %v2150_v13 = vshrl.u32 %v1173_v12, 7 }
 0x123   : > { %1097 = vmatpush1.bf16.msra.mxu0 %v1773_v14  ;;  %v1175_v14 = vsub.s32 0, %v2150_v13 }
 0x124   : > { %1563 = vmatmul.mubr.msk.bf16.vlgmr.msra.gmra.mxu1 %vm687_vm5, %v503_v3 }
 0x125   : > { %1655 = vmatpush3.bf16.msra.mxu1 %v2064_v24  ;;  %867 = vmatprep.mubr.bf16.mxu1 %v1927_v36 }
 0x12c   : > { %1564 = vmatmul.mubr.msk.bf16.gmra.mxu1 %vm687_vm5, %v504_v4 }
 0x12d   : > { %877 = vmatprep.mubr.bf16.mxu1 %v1927_v36 }
 0x134   : > { %1565 = vmatmul.mubr.msk.bf16.gmra.mxu1 %vm687_vm5, %v505_v5 }
 0x135   : > { %887 = vmatprep.mubr.bf16.mxu1 %v1927_v36 }
 0x13c   : > { %1566 = vmatmul.mubr.msk.bf16.gmra.mxu1 %vm687_vm5, %v506_v6 }
 0x13d   : > { %1656 = vmatprep.mubr.msk.bf16.mxu1 %vm398_vm0, %v1756_v56 }
 0x144   : > { %1657 = vmatmul.mubr.msk.bf16.vlgmr.msra.gmra.mxu1 %vm398_vm0, %v1757_v63 }
 0x1cc   : > { %v744_v15 = vpop.f32.mrf.mxu1 }
 0x1ce   : > { %v734_v16 = vpop.f32.mrf.mxu0  ;;  %v746_v17 = vpop.f32.mrf.mxu1 }
 0x1d0   : > { %v736_v18 = vpop.f32.mrf.mxu0  ;;  %v748_v19 = vpop.f32.mrf.mxu1 }
 0x1d2   : > { %v738_v20 = vpop.f32.mrf.mxu0  ;;  %v750_v21 = vpop.f32.mrf.mxu1 }
 0x1d4   : > { %v740_v22 = vpop.f32.mrf.mxu0  ;;  %v754_v23 = vpop.f32.mrf.mxu1 }
 0x1d6   : > { %v756_v24 = vpop.f32.mrf.mxu1  ;;  %v1652_v25 = vpop.f32.mrf.mxu0 }
 0x1d8   : > { %v758_v26 = vpop.f32.mrf.mxu1  ;;  %v953_v27 = vpop.f32.mrf.mxu0 }
 0x1da   : > { %v760_v28 = vpop.f32.mrf.mxu1  ;;  %v1653_v29 = vpop.f32.mrf.mxu0 }
 0x1db   : > { %v1018_v37 = vpack.c.bf16 %v1653_v29, %v1652_v25 }
 0x1dc   : > { %v764_v30 = vpop.f32.mrf.mxu1  ;;  %v956_v31 = vpop.f32.mrf.mxu0 }
 0x1dd   : > { %v1017_v32 = vpack.c.bf16 %v956_v31, %v953_v27 }
 0x1de   : > { %v766_v33 = vpop.f32.mrf.mxu1 }
 0x1df   : > { %1585 = vmatmul.mubr.msk.bf16.vlgmr.msra.gmra.mxu0 %vm687_vm5, %v1017_v32 }
 0x1e0   : > { %v768_v34 = vpop.f32.mrf.mxu1  ;;  %1124 = vmatprep.mubr.bf16.mxu0 %v1927_v36 }
 0x1e2   : > { %v770_v35 = vpop.f32.mrf.mxu1 }
 0x1e4   : > { %v859_v38 = vpop.f32.mrf.mxu1 }
 0x1e5   : > { %v860_v39 = vadd.f32 %v859_v38, %v734_v16  ;;  %v1179_v16 = vsub.s32 1, %v2150_v13 }
 0x1e6   : > { %v861_v40 = vpop.f32.mrf.mxu1 }
 0x1e7   : > { %v862_v41 = vadd.f32 %v861_v40, %v736_v18  ;;  %1586 = vmatmul.mubr.msk.bf16.gmra.mxu0 %vm687_vm5, %v1018_v37 }
 0x1e8   : > { %v863_v42 = vpop.f32.mrf.mxu1  ;;  %1134 = vmatprep.mubr.bf16.mxu0 %v1927_v36 }
 0x1e9   : > { %v864_v43 = vadd.f32 %v863_v42, %v738_v20 }
 0x1ea   : > { %v865_v44 = vpop.f32.mrf.mxu1 }
 0x1eb   : > { %v866_v45 = vadd.f32 %v865_v44, %v740_v22 }
 0x1ec   : > { %v869_v46 = vpop.f32.mrf.mxu1 }
 0x1ed   : > { %v870_v47 = vadd.f32 %v869_v46, %v744_v15  ;;  %v1171_v15 = vld [vmem:[%s2341_s5] sm:$0x3] }
 0x1ee   : > { %v871_v48 = vpop.f32.mrf.mxu1 }
 0x1ef   : > { %v2124_v49 = vadd.f32 %v871_v48, %v746_v17 }
 0x1f0   : > { %v873_v50 = vpop.f32.mrf.mxu1 }
 0x1f1   : > { %v2126_v51 = vadd.f32 %v873_v50, %v748_v19  ;;  %v2163_v19 = vrot.slane %v1171_v15, %v1179_v16 }
 0x1f2   : > { %v875_v52 = vpop.f32.mrf.mxu1 }
 0x1f3   : > { %v2128_v53 = vadd.f32 %v875_v52, %v750_v21 }
 0x1f4   : > { %v879_v54 = vpop.f32.mrf.mxu1 }
 0x1f5   : > { %v2130_v55 = vadd.f32 %v879_v54, %v754_v23 }
 0x1f6   : > { %v881_v56 = vpop.f32.mrf.mxu1 }
 0x1f7   : > { %v2132_v57 = vadd.f32 %v881_v56, %v756_v24 }
 0x1f8   : > { %v883_v58 = vpop.f32.mrf.mxu1 }
 0x1f9   : > { %v2134_v59 = vadd.f32 %v883_v58, %v758_v26 }
 0x1fa   : > { %v885_v60 = vpop.f32.mrf.mxu1 }
 0x1fb   : > { %v2136_v61 = vadd.f32 %v885_v60, %v760_v28 }
 0x1fc   : > { %v889_v62 = vpop.f32.mrf.mxu1 }
 0x1fd   : > { %v2138_v63 = vadd.f32 %v889_v62, %v764_v30 }
 0x1fe   : > { %v891_v0 = vpop.f32.mrf.mxu1 }
 0x1ff   : > { %v2140_v1 = vadd.f32 %v891_v0, %v766_v33 }
 0x200   : > { %v893_v2 = vpop.f32.mrf.mxu1 }
 0x201   : > { %v2142_v3 = vadd.f32 %v893_v2, %v768_v34 }
 0x202   : > { %v895_v4 = vpop.f32.mrf.mxu1 }
 0x203   : > { %v2144_v5 = vadd.f32 %v895_v4, %v770_v35 }
 0x204   : > { %v1658_v6 = vpop.f32.mrf.mxu1 }
 0x206   : > { %v1002_v7 = vpop.f32.mrf.mxu1 }
 0x208   : > { %v1659_v8 = vpop.f32.mrf.mxu1 }
 0x209   : > { %v1020_v11 = vpack.c.bf16 %v1659_v8, %v1658_v6 }
 0x20a   : > { %v1005_v9 = vpop.f32.mrf.mxu1 }
 0x20b   : > { %v1019_v10 = vpack.c.bf16 %v1005_v9, %v1002_v7 }
 0x20d   : > { %1587 = vmatmul.mubr.msk.bf16.gmra.mxu0 %vm687_vm5, %v1019_v10 }
 0x20e   : > { %1144 = vmatprep.mubr.bf16.mxu0 %v1927_v36  ;;  %v2161_v36 = vrot.slane %v1171_v15, %v1175_v14 }
 0x215   : > { %1588 = vmatmul.mubr.msk.bf16.gmra.mxu0 %vm687_vm5, %v1020_v11 }
 0x29f   : > { %v1116_v17 = vpop.f32.mrf.mxu0 }
 0x2a0   : > { %v1155_v18 = vadd.f32 %v1116_v17, %v860_v39 }
 0x2a1   : > { %v1118_v20 = vpop.f32.mrf.mxu0 }
 0x2a2   : > { %v1183_v21 = vadd.f32 %v2161_v36, %v1155_v18  ;;  %v1156_v22 = vadd.f32 %v1118_v20, %v862_v41 }
 0x2a3   : > { %v1120_v23 = vpop.f32.mrf.mxu0 }
 0x2a4   : > { %1199 = vst [vmem:[%s2166_s26] sm:$0xff] %v1183_v21  ;;  %v1184_v24 = vadd.f32 %v2163_v19, %v1156_v22  ;;  %v1157_v25 = vadd.f32 %v1120_v23, %v864_v43  ;;  %v1264_v29 = vmul.f32 %v1183_v21, %v1183_v21 }
 0x2a5   : > { %v1122_v26 = vpop.f32.mrf.mxu0 }
 0x2a6   : > { %1200 = vst [vmem:[%s2166_s26 + $0x8] sm:$0xff] %v1184_v24  ;;  %v1185_v27 = vadd.f32 %v2161_v36, %v1157_v25  ;;  %v1158_v28 = vadd.f32 %v1122_v26, %v866_v45  ;;  %v1265_v35 = vmul.f32 %v1184_v24, %v1184_v24 }
 0x2a7   : > { %v1126_v30 = vpop.f32.mrf.mxu0 }
 0x2a8   : > { %1201 = vst [vmem:[%s2166_s26 + $0x10] sm:$0xff] %v1185_v27  ;;  %v1215_v31 = vadd.f32 %v1185_v27, %v1183_v21  ;;  %v1266_v32 = vmul.f32 %v1185_v27, %v1185_v27  ;;  %v1186_v33 = vadd.f32 %v2163_v19, %v1158_v28  ;;  %v1159_v34 = vadd.f32 %v1126_v30, %v870_v47 }
 0x2a9   : > { %v1128_v37 = vpop.f32.mrf.mxu0 }
 0x2aa   : > { %v1280_v38 = vadd.f32 %v1266_v32, %v1264_v29  ;;  %1202 = vst [vmem:[%s2166_s26 + $0x18] sm:$0xff] %v1186_v33  ;;  %v1228_v39 = vadd.f32 %v1186_v33, %v1184_v24  ;;  %v1267_v40 = vmul.f32 %v1186_v33, %v1186_v33  ;;  %v1187_v41 = vadd.f32 %v2161_v36, %v1159_v34 }
 0x2ab   : > { %v1160_v42 = vadd.f32 %v1128_v37, %v2124_v49  ;;  %v1130_v43 = vpop.f32.mrf.mxu0 }
 0x2ac   : > { %v1293_v44 = vadd.f32 %v1267_v40, %v1265_v35  ;;  %1203 = vst [vmem:[%s2166_s26 + $0x20] sm:$0xff] %v1187_v41  ;;  %v1216_v45 = vadd.f32 %v1215_v31, %v1187_v41  ;;  %v1268_v46 = vmul.f32 %v1187_v41, %v1187_v41  ;;  %v1161_v47 = vadd.f32 %v1130_v43, %v2126_v51 }
 0x2ad   : > { %v1188_v48 = vadd.f32 %v2163_v19, %v1160_v42  ;;  %v1132_v50 = vpop.f32.mrf.mxu0 }
 0x2ae   : > { %v1281_v52 = vadd.f32 %v1280_v38, %v1268_v46  ;;  %v1189_v54 = vadd.f32 %v2161_v36, %v1161_v47  ;;  %v1162_v56 = vadd.f32 %v1132_v50, %v2128_v53 }
 0x2af   : > { %1204 = vst [vmem:[%s2166_s26 + $0x28] sm:$0xff] %v1188_v48  ;;  %v1229_v58 = vadd.f32 %v1228_v39, %v1188_v48  ;;  %v1269_v60 = vmul.f32 %v1188_v48, %v1188_v48 }
 0x2b0   : > { %1205 = vst [vmem:[%s2166_s26 + $0x30] sm:$0xff] %v1189_v54  ;;  %v1217_v49 = vadd.f32 %v1216_v45, %v1189_v54  ;;  %v1270_v62 = vmul.f32 %v1189_v54, %v1189_v54  ;;  %v1190_v0 = vadd.f32 %v2163_v19, %v1162_v56 }
 0x2b1   : > { %v1294_v2 = vadd.f32 %v1293_v44, %v1269_v60 }
 0x2b2   : > { %v1282_v4 = vadd.f32 %v1281_v52, %v1270_v62  ;;  %1206 = vst [vmem:[%s2166_s26 + $0x38] sm:$0xff] %v1190_v0  ;;  %v1230_v51 = vadd.f32 %v1229_v58, %v1190_v0  ;;  %v1271_v6 = vmul.f32 %v1190_v0, %v1190_v0 }
 0x2b4   : > { %v1295_v7 = vadd.f32 %v1294_v2, %v1271_v6 }
 0x2cd   : > { %v1136_v8 = vpop.f32.mrf.mxu0 }
 0x2ce   : > { %v1163_v9 = vadd.f32 %v1136_v8, %v2130_v55 }
 0x2cf   : > { %v1138_v53 = vpop.f32.mrf.mxu0 }
 0x2d0   : > { %v1191_v10 = vadd.f32 %v2161_v36, %v1163_v9  ;;  %v1164_v11 = vadd.f32 %v1138_v53, %v2132_v57 }
 0x2d1   : > { %v1140_v14 = vpop.f32.mrf.mxu0 }
 0x2d2   : > { %1207 = vst [vmem:[%s2166_s26 + $0x40] sm:$0xff] %v1191_v10  ;;  %v1218_v15 = vadd.f32 %v1217_v49, %v1191_v10  ;;  %v1272_v16 = vmul.f32 %v1191_v10, %v1191_v10  ;;  %v1192_v17 = vadd.f32 %v2163_v19, %v1164_v11  ;;  %v1165_v18 = vadd.f32 %v1140_v14, %v2134_v59 }
 0x2d3   : > { %v1142_v20 = vpop.f32.mrf.mxu0 }
 0x2d4   : > { %v1283_v21 = vadd.f32 %v1282_v4, %v1272_v16  ;;  %1208 = vst [vmem:[%s2166_s26 + $0x48] sm:$0xff] %v1192_v17  ;;  %v1231_v22 = vadd.f32 %v1230_v51, %v1192_v17  ;;  %v1273_v55 = vmul.f32 %v1192_v17, %v1192_v17  ;;  %v1193_v23 = vadd.f32 %v2161_v36, %v1165_v18 }
 0x2d5   : > { %v1166_v24 = vadd.f32 %v1142_v20, %v2136_v61  ;;  %v1146_v57 = vpop.f32.mrf.mxu0 }
 0x2d6   : > { %v1296_v25 = vadd.f32 %v1295_v7, %v1273_v55  ;;  %1209 = vst [vmem:[%s2166_s26 + $0x50] sm:$0xff] %v1193_v23  ;;  %v1219_v26 = vadd.f32 %v1218_v15, %v1193_v23  ;;  %v1274_v27 = vmul.f32 %v1193_v23, %v1193_v23  ;;  %v1167_v28 = vadd.f32 %v1146_v57, %v2138_v63 }
 0x2d7   : > { %v1194_v59 = vadd.f32 %v2163_v19, %v1166_v24  ;;  %v1148_v29 = vpop.f32.mrf.mxu0 }
 0x2d8   : > { %v1284_v30 = vadd.f32 %v1283_v21, %v1274_v27  ;;  %v1195_v31 = vadd.f32 %v2161_v36, %v1167_v28  ;;  %v1168_v32 = vadd.f32 %v1148_v29, %v2140_v1 }
 0x2d9   : > { %1210 = vst [vmem:[%s2166_s26 + $0x58] sm:$0xff] %v1194_v59  ;;  %v1232_v61 = vadd.f32 %v1231_v22, %v1194_v59  ;;  %v1275_v33 = vmul.f32 %v1194_v59, %v1194_v59  ;;  %v1150_v34 = vpop.f32.mrf.mxu0 }
 0x2da   : > { %1211 = vst [vmem:[%s2166_s26 + $0x60] sm:$0xff] %v1195_v31  ;;  %v1220_v35 = vadd.f32 %v1219_v26, %v1195_v31  ;;  %v1276_v37 = vmul.f32 %v1195_v31, %v1195_v31  ;;  %v1196_v63 = vadd.f32 %v2163_v19, %v1168_v32  ;;  %v1169_v38 = vadd.f32 %v1150_v34, %v2142_v3 }
 0x2db   : > { %v1297_v39 = vadd.f32 %v1296_v25, %v1275_v33  ;;  %v1152_v40 = vpop.f32.mrf.mxu0 }
 0x2dc   : > { %v1285_v41 = vadd.f32 %v1284_v30, %v1276_v37  ;;  %1212 = vst [vmem:[%s2166_s26 + $0x68] sm:$0xff] %v1196_v63  ;;  %v1233_v1 = vadd.f32 %v1232_v61, %v1196_v63  ;;  %v1277_v42 = vmul.f32 %v1196_v63, %v1196_v63  ;;  %v1197_v43 = vadd.f32 %v2161_v36, %v1169_v38 }
 0x2dd   : > { %v1170_v44 = vadd.f32 %v1152_v40, %v2144_v5 }
 0x2de   : > { %v1298_v45 = vadd.f32 %v1297_v39, %v1277_v42  ;;  %1213 = vst [vmem:[%s2166_s26 + $0x70] sm:$0xff] %v1197_v43  ;;  %v1221_v46 = vadd.f32 %v1220_v35, %v1197_v43  ;;  %v1278_v47 = vmul.f32 %v1197_v43, %v1197_v43 }
 0x2df   : > { %v1198_v3 = vadd.f32 %v2163_v19, %v1170_v44 }
 0x2e0   : > { %v1222_v36 = vrot.slane %v1221_v46, 4  ;;  %v1286_v48 = vadd.f32 %v1285_v41, %v1278_v47 }
 0x2e1   : > { %1214 = vst [vmem:[%s2166_s26 + $0x78] sm:$0xff] %v1198_v3  ;;  %v1234_v5 = vadd.f32 %v1233_v1, %v1198_v3  ;;  %v1279_v50 = vmul.f32 %v1198_v3, %v1198_v3 }
 0x2e2   : > { %v1223_v52 = vadd.f32 %v1222_v36, %v1221_v46  ;;  %v1287_v54 = vrot.slane %v1286_v48, 4 }
 0x2e3   : > { %1815 = shalt.err (!%p1812_p0)
}
 0x2e4   : > { %s1816_s26 = scalar_lea.hbm %s2213_s17, 2048  ;;  %s1820_s19 = scalar_lea.hbm %s2342_s6, 4096 }
 0x2e5   : > { %p1817_p1 = scmp.ne.s32.totalorder %s2213_s17, %s1816_s26  ;;  %p1821_p4 = scmp.lt.s32.totalorder %s2213_s17, %s2342_s6 }
 0x2e6   : > { %p1822_p7 = scmp.lt.s32.totalorder %s1820_s19, %s1816_s26 }
 0x2e7   : > { %p1818_p2 = pnand %p1817_p1, %p2019_p5 }
 0x2e8   : > { %p1823_p8 = por %p1822_p7, %p1821_p4 }
 0x2e9   : > { %p1819_p3 = pneg %p1818_p2 }
 0x2eb   : > { %p1824_p6 = pnand %p1823_p8, %p1819_p3 }
 0x2ed   : > { %1827 = shalt.err (!%p1824_p6)
}
 0x2ee   : > { %s1929_s21 = smov 256   ;;  %s1930_s24 = smov 16   ;;  %v1235_v19 = vrot.slane %v1234_v5, 4  ;;  %v1299_v56 = vadd.f32 %v1298_v45, %v1279_v50  ;;  %v1224_v58 = vrot.slane %v1223_v52, 2  ;;  %v1288_v60 = vadd.f32 %v1287_v54, %v1286_v48 }
 0x2ef   : > { %1672 = dma.vmem_to_hbm [thread:$0]  (%p2019_p5), %s2215_s13, 2048, %s2213_s17, %s1326_s20, %s1929_s21, %s1929_s21, %s1930_s24   ;;  %v1931_v0 = vmov 1966171168   ;;  %vm2247_vm6 = vcmp.lt.s32.totalorder %v1173_v12, 256 }
 0x2f0   : > { %v1236_v49 = vadd.f32 %v1235_v19, %v1234_v5  ;;  %v1300_v62 = vrot.slane %v1299_v56, 4  ;;  %v1245_v2 = vunpack.c.l.s4 %v1931_v0  ;;  %v1225_v4 = vadd.f32 %v1224_v58, %v1223_v52  ;;  %s1520_s10 = sshll.u32 %s2154_s22, 1  ;;  %s1330_s13 = sand.u32 1, %s2000_s9  }
 0x2f1   : > { %v1289_v51 = vrot.slane %v1288_v60, 2  ;;  %s1604_s17 = sshll.u32 %s2000_s9, 5  ;;  %s327_s20 = scalar_lea.vmem [#allocation6], %s1520_s10 }
 0x2f2   : > { %v1237_v6 = vrot.slane %v1236_v49, 2  ;;  %v1301_v7 = vadd.f32 %v1300_v62, %v1299_v56  ;;  %v1226_v9 = vrot.slane %v1225_v4, 1  ;;  %v1246_v11 = vunpack.c.0.s8 %v1245_v2  ;;  %s1367_s25 = sshll.u32 %s327_s20, 4  ;;  %s2251_s22 = scalar_lea.vmem [#allocation8], %s1520_s10  ;;  %s2259_s25 = int_to_ptr.vmem [resolvable:$true] %s1367_s25 }
 0x2f3   : > { %v1290_v8 = vadd.f32 %v1289_v51, %v1288_v60  ;;  %s1381_s26 = sshll.u32 %s2251_s22, 4  ;;  %s2257_s19 = scalar_lea.hbm %s2343_s7, %s1604_s17  ;;  %s2268_s26 = int_to_ptr.vmem [resolvable:$true] %s1381_s26 }
 0x2f4   : > { %v1238_v53 = vadd.f32 %v1237_v6, %v1236_v49  ;;  %v1302_v10 = vrot.slane %v1301_v7, 2  ;;  %v1227_v17 = vadd.f32 %v1226_v9, %v1225_v4  ;;  %v1249_v21 = vsub.s32 %v1246_v11, %v2150_v13  ;;  %s2266_s21 = scalar_lea.hbm %s2344_s8, %s1604_s17  ;;  %s2270_s24 = scalar_lea.sflag [#allocation7], %s1330_s13 }
 0x2f5   : > { %v1291_v14 = vrot.slane %v1290_v8, 1  ;;  %s1828_s10 = scalar_lea.vmem %s2259_s25, 32  ;;  %s1932_s12 = smov [#allocation6]  }
 0x2f6   : > { %v1239_v15 = vrot.slane %v1238_v53, 1  ;;  %v1303_v16 = vadd.f32 %v1302_v10, %v1301_v7  ;;  %p1829_p9 = scmp.ne.s32.totalorder %s2259_s25, %s1828_s10  ;;  %s1832_s18 = sshll.u32 %s1932_s12, 4  ;;  %s1833_s18 = int_to_ptr.vmem [resolvable:$false] %s1832_s18 }
 0x2f7   : > { %v1292_v22 = vadd.f32 %v1291_v14, %v1290_v8  ;;  %s1834_s0 = scalar_lea.vmem %s1833_s18, 64  ;;  %p1835_p12 = scmp.lt.s32.totalorder %s2259_s25, %s1833_s18 }
 0x2f8   : > { %v1240_v18 = vadd.f32 %v1239_v15, %v1238_v53  ;;  %v1304_v20 = vrot.slane %v1303_v16, 1  ;;  %p1830_p10 = pnand %p1829_p9, %p2019_p5  ;;  %p1836_p13 = scmp.lt.s32.totalorder %s1834_s0, %s1828_s10 }
 0x2fa   : > { %v1243_v55 = vcombine.low %v1227_v17, %v1240_v18  ;;  %v1305_v23 = vadd.f32 %v1304_v20, %v1303_v16  ;;  %p1831_p11 = pneg %p1830_p10  ;;  %p1837_p0 = por %p1836_p13, %p1835_p12 }
 0x2fc   : > { %v1308_v24 = vcombine.low %v1292_v22, %v1305_v23  ;;  %v1250_v57 = vrot.slane %v1243_v55, %v1249_v21  ;;  %p1838_p1 = pnand %p1837_p0, %p1831_p11 }
 0x2fe   : > { %v1257_v13 = vrot.slane %v1250_v57, %v1249_v21  ;;  %v1315_v26 = vrot.slane %v1308_v24, %v1249_v21 }
 0x300   : > { %1263 = vst.msk [vmem:[%s327_s20] sm:$0x3] %vm2247_vm6, %v1257_v13  ;;  %v1322_v12 = vrot.slane %v1315_v26, %v1249_v21 }
 0x301   : > { %1841 = shalt.err (!%p1838_p1)
}
 0x302   : > { %s1842_s13 = scalar_lea.hbm %s2257_s19, 32  ;;  %s1846_s9 = scalar_lea.hbm %s2343_s7, 64 }
 0x303   : > { %p1843_p2 = scmp.ne.s32.totalorder %s2257_s19, %s1842_s13  ;;  %p1847_p7 = scmp.lt.s32.totalorder %s2257_s19, %s2343_s7 }
 0x304   : > { %p1848_p8 = scmp.lt.s32.totalorder %s1846_s9, %s1842_s13 }
 0x305   : > { %p1844_p3 = pnand %p1843_p2, %p2019_p5 }
 0x306   : > { %p1849_p6 = por %p1848_p8, %p1847_p7 }
 0x307   : > { %p1845_p4 = pneg %p1844_p3 }
 0x309   : > { %p1850_p9 = pnand %p1849_p6, %p1845_p4 }
 0x30b   : > { %1853 = shalt.err (!%p1850_p9)
}
 0x30c   : > { %1673 = dma.vmem_to_hbm [thread:$0]  (%p2019_p5), %s2259_s25, 32, %s2257_s19, %s2270_s24   ;;  %1324 = vst.msk [vmem:[%s2251_s22] sm:$0x3] %vm2247_vm6, %v1322_v12 }
 0x30d   : > { %s1854_s0 = scalar_lea.vmem %s2268_s26, 32  ;;  %s1933_s10 = smov [#allocation8]  }
 0x30e   : > { %p1855_p10 = scmp.ne.s32.totalorder %s2268_s26, %s1854_s0  ;;  %s1858_s18 = sshll.u32 %s1933_s10, 4  ;;  %s1859_s18 = int_to_ptr.vmem [resolvable:$false] %s1858_s18 }
 0x30f   : > { %s1860_s13 = scalar_lea.vmem %s1859_s18, 64  ;;  %p1861_p13 = scmp.lt.s32.totalorder %s2268_s26, %s1859_s18 }
 0x310   : > { %p1856_p11 = pnand %p1855_p10, %p2019_p5  ;;  %p1862_p0 = scmp.lt.s32.totalorder %s1860_s13, %s1854_s0 }
 0x312   : > { %p1857_p12 = pneg %p1856_p11  ;;  %p1863_p1 = por %p1862_p0, %p1861_p13 }
 0x314   : > { %p1864_p2 = pnand %p1863_p1, %p1857_p12 }
 0x316   : > { %1867 = shalt.err (!%p1864_p2)
}
 0x317   : > { %s1868_s25 = scalar_lea.hbm %s2266_s21, 32  ;;  %s1872_s17 = scalar_lea.hbm %s2344_s8, 64 }
 0x318   : > { %p1869_p3 = scmp.ne.s32.totalorder %s2266_s21, %s1868_s25  ;;  %p1873_p8 = scmp.lt.s32.totalorder %s2266_s21, %s2344_s8 }
 0x319   : > { %p1874_p6 = scmp.lt.s32.totalorder %s1872_s17, %s1868_s25 }
 0x31a   : > { %p1870_p4 = pnand %p1869_p3, %p2019_p5 }
 0x31b   : > { %p1875_p9 = por %p1874_p6, %p1873_p8 }
 0x31c   : > { %p1871_p7 = pneg %p1870_p4 }
 0x31e   : > { %p1876_p10 = pnand %p1875_p9, %p1871_p7 }
 0x320   : > { %1879 = shalt.err (!%p1876_p10)
}
 0x321   : > { %1674 = dma.vmem_to_hbm [thread:$0]  (%p2019_p5), %s2268_s26, 32, %s2266_s21, %s2270_s24  }
 0x322 PF: > { %p1694_p11 = scmp.ge.s32.totalorder %s1922_s30, 2  ;;  %s1393_s23 = sand.u32 1, %s1910_s27  }
 0x323   : > { %p2353_p12 = scmp.ne.s32.totalorder %s2348_s16, 0  ;;  %s1394_s12 = scalar_lea.sflag [#allocation4], %s1393_s23 }
 0x325   : > { %p1683_p13 = pnand %p1694_p11, %p2353_p12 }
 0x327   : > { %p1684_p0 = pneg %p1683_p13 }
 0x329   : > { %1901 = dma.done.wait (%p1684_p0), %s1394_s12, 2048  }
 0x32a   : > { %1903 = vsyncadd (%p1684_p0), %s1394_s12, 4294965248  ;;  %s2354_s0 = sadd.s32 4294967294, %s1922_s30  }
 0x32b   : > { %s1402_s10 = sand.u32 1, %s2354_s0  }
 0x32c   : > { %s1403_s15 = scalar_lea.sflag [#allocation7], %s1402_s10 }
 0x32d   : > { %1905 = dma.done.wait (%p1684_p0), %s1403_s15, 64  }
 0x32e   : > { %1907 = vsyncadd (%p1684_p0), %s1403_s15, 4294967232  ;;  %p23_p5 = scmp.ge.s32.totalorder %s2004_s11, 4   ;;  %s2355_s27 = smov %s1914_s28 }
 0x32f   : > { %s2356_s28 = smov %s1918_s29  ;;  %s2357_s29 = smov %s2017_s14 }
 0x330   : > { %s2358_s30 = smov %s2004_s11  ;;  %25 = sbr.rel (!%p23_p5) target bundleno = 8 (0x8), region = 120 }
 0x335   :  { %1417 = vsyncpa [#allocation3], 1 }
 0x336   :  { %1419 = vsyncpa [#allocation3 + $0x1], 1 }
 0x337   :  { %1420 = vsyncpa [#allocation4], 1 }
 0x338   :  { %1422 = vsyncpa [#allocation4 + $0x1], 1 }
 0x339   :  { %1423 = vsyncpa [#allocation7], 1 }
 0x33a   :  { %1425 = vsyncpa [#allocation7 + $0x1], 1 }

</bundles_post_ra>
